<compile_context>
chip_gen: v7x
topology: tpu7x:2x2x1
jax: 0.10.0
libtpu: 0.0.40
codegen_flags: <defaults>
</compile_context>

<pallas_src>
import math

import numpy as np

import jax
import jax.numpy as jnp
from jax.experimental import pallas as pl
from jax.experimental.pallas import tpu as pltpu

# ---------------- scaled-down BERT config ----------------
VOCAB = 100
VOCAB_PAD = 128          # word table padded to a full lane width for the one-hot matmul
MAX_POS = 16
HIDDEN = 32
N_HEADS = 2
HEAD_DIM = HIDDEN // N_HEADS
FFN = 64
N_LAYERS = 2
LN_EPS = 1e-12


# ---------------- fused forward kernel (one grid step per batch tile) ----------------
def _fused_forward_kernel(
    ids_ref, mask_ref, extras_ref, blkdiag_ref, cls_sel_ref, pos_type_ref,
    word_emb_ref, emb_ln_g_ref, emb_ln_b_ref,
    wq_ref, wk_ref, wv_ref, bq_ref, bk_ref, bv_ref, wo_ref, bo_ref,
    ln1_g_ref, ln1_b_ref, w1_ref, b1_ref, w2_ref, b2_ref, ln2_g_ref, ln2_b_ref,
    pool_w_ref, pool_b_ref, head_wh_ref, head_wx_ref, head_b_ref,
    out_ref,
):
    f32, bf16 = jnp.float32, jnp.bfloat16
    m_rows = ids_ref.shape[0]            # TB * S
    vocab_pad = word_emb_ref.shape[0]
    n_layers, n_heads = wq_ref.shape[0], wq_ref.shape[1]

    def layer_norm(x, g, b):
        # Single-pass variance: E[x^2] - E[x]^2 (two back-to-back XLU reductions).
        mean = jnp.mean(x, axis=-1, keepdims=True)
        mean_sq = jnp.mean(x * x, axis=-1, keepdims=True)
        var = mean_sq - mean * mean
        return (x - mean) * jax.lax.rsqrt(var + LN_EPS) * g + b

    # ---- in-kernel embedding gather: one-hot(ids) @ padded word table (MXU) ----
    ids = ids_ref[...]                                                     # (M, 1) i32
    lane = jax.lax.broadcasted_iota(jnp.int32, (m_rows, vocab_pad), 1)
    onehot = jnp.where(lane == ids, 1.0, 0.0).astype(bf16)                 # (M, VOCAB_PAD)
    emb = (jnp.dot(onehot, word_emb_ref[...], preferred_element_type=f32)
           + pos_type_ref[...])                                            # (M, H)
    x = layer_norm(emb, emb_ln_g_ref[...], emb_ln_b_ref[...])              # (M, H) f32

    # ---- block-diagonal (per-sample) + key-padding attention bias, hoisted ----
    bias = blkdiag_ref[...] + (mask_ref[...] - 1.0) * 1e9                  # (M, M)

    # Static unroll is fine at 2 layers / 2 heads (sub-vreg tensors; LLO visibility).
    for l in range(n_layers):
        xb = x.astype(bf16)
        attn_out = jnp.zeros_like(x)
        for h in range(n_heads):
            # Per-head weights -> no narrow lane slices, no lane-axis concat.
            q = jnp.dot(xb, wq_ref[l, h], preferred_element_type=f32) + bq_ref[l, h]
            k = jnp.dot(xb, wk_ref[l, h], preferred_element_type=f32) + bk_ref[l, h]
            v = jnp.dot(xb, wv_ref[l, h], preferred_element_type=f32) + bv_ref[l, h]
            # 1/sqrt(Dh) already folded into wq/bq at prep time.
            scores = jnp.einsum("md,nd->mn", q.astype(bf16), k.astype(bf16),
                                preferred_element_type=f32) + bias         # (M, M)
            mx = jnp.max(scores, axis=-1, keepdims=True)
            e = jnp.exp(scores - mx)
            p = e * pl.reciprocal(jnp.sum(e, axis=-1, keepdims=True), approx=True)
            ctx = jnp.dot(p.astype(bf16), v.astype(bf16),
                          preferred_element_type=f32)                      # (M, DH)
            attn_out = attn_out + jnp.dot(ctx.astype(bf16), wo_ref[l, h],
                                          preferred_element_type=f32)      # accumulate heads
        x = layer_norm(attn_out + bo_ref[l] + x, ln1_g_ref[l], ln1_b_ref[l])

        # tanh-approximate GELU (EUP-friendly); BERT's erf-GELU differs by <1e-3.
        ff = jnp.dot(x.astype(bf16), w1_ref[l], preferred_element_type=f32) + b1_ref[l]
        ff = jax.nn.gelu(ff, approximate=True)
        ff = jnp.dot(ff.astype(bf16), w2_ref[l], preferred_element_type=f32) + b2_ref[l]
        x = layer_norm(ff + x, ln2_g_ref[l], ln2_b_ref[l])

    # ---- pooler on CLS rows (constant one-hot selector matmul) + regression head ----
    cls = jnp.dot(cls_sel_ref[...], x.astype(bf16),
                  preferred_element_type=f32)                              # (TB, H)
    pooled = jnp.tanh(jnp.dot(cls.astype(bf16), pool_w_ref[...],
                              preferred_element_type=f32) + pool_b_ref[...])
    # TODO(synk): Dropout(0.5) implemented as eval-mode identity (no RNG mask applied).
    value = (jnp.sum(pooled * head_wh_ref[...], axis=-1, keepdims=True)
             + jnp.sum(extras_ref[...] * head_wx_ref[...], axis=-1, keepdims=True)
             + head_b_ref[...])                                            # (TB, 1)
    out_ref[...] = value                                                   # one slab store


# ---------------- parameters (deterministic init, PyTorch-like raw layout) ----------------
def init_params(key):
    H, F, L = HIDDEN, FFN, N_LAYERS

    def nrm(k, shape, scale=0.02):
        return scale * jax.random.normal(k, shape, dtype=jnp.float32)

    keys = jax.random.split(key, 6 + L)
    params = {
        "word_emb": nrm(keys[0], (VOCAB, H)),
        "pos_emb": nrm(keys[1], (MAX_POS, H)),
        "type_emb": nrm(keys[2], (2, H)),
        "emb_ln_g": jnp.ones((H,), jnp.float32),
        "emb_ln_b": jnp.zeros((H,), jnp.float32),
        "pool_w": nrm(keys[3], (H, H)),
        "pool_b": jnp.zeros((H,), jnp.float32),
        "head_w": nrm(keys[4], (H + 2, 1)),      # Linear(768+2, 1) analogue
        "head_b": jnp.zeros((1,), jnp.float32),
    }

    layers = {n: [] for n in ["wq", "wk", "wv", "wo", "w1", "w2",
                              "bq", "bk", "bv", "bo", "b1", "b2",
                              "ln1_g", "ln1_b", "ln2_g", "ln2_b"]}
    for l in range(L):
        lk = jax.random.split(keys[6 + l], 6)
        layers["wq"].append(nrm(lk[0], (H, H)))
        layers["wk"].append(nrm(lk[1], (H, H)))
        layers["wv"].append(nrm(lk[2], (H, H)))
        layers["wo"].append(nrm(lk[3], (H, H)))
        layers["w1"].append(nrm(lk[4], (H, F)))
        layers["w2"].append(nrm(lk[5], (F, H)))
        layers["bq"].append(jnp.zeros((H,), jnp.float32))
        layers["bk"].append(jnp.zeros((H,), jnp.float32))
        layers["bv"].append(jnp.zeros((H,), jnp.float32))
        layers["bo"].append(jnp.zeros((H,), jnp.float32))
        layers["b1"].append(jnp.zeros((F,), jnp.float32))
        layers["b2"].append(jnp.zeros((H,), jnp.float32))
        layers["ln1_g"].append(jnp.ones((H,), jnp.float32))
        layers["ln1_b"].append(jnp.zeros((H,), jnp.float32))
        layers["ln2_g"].append(jnp.ones((H,), jnp.float32))
        layers["ln2_b"].append(jnp.zeros((H,), jnp.float32))
    params.update({n: jnp.stack(v, 0) for n, v in layers.items()})
    return params


# ---------------- one-time kernel-ready prep (bf16 casts, per-head splits, constants) ----------------
def prepare_params(params, batch_tile, seq_len):
    H, F, L, NH, DH = HIDDEN, FFN, N_LAYERS, N_HEADS, HEAD_DIM
    TB, S = batch_tile, seq_len
    M = TB * S
    inv_sqrt_dh = 1.0 / math.sqrt(DH)
    bf = lambda a: a.astype(jnp.bfloat16)

    # Padded bf16 word table (extra rows are zero and never selected: ids < VOCAB).
    word_pad = jnp.zeros((VOCAB_PAD, H), jnp.float32).at[:VOCAB, :].set(params["word_emb"])
    # position + token_type_ids=None (type 0) embedding, tiled to the batch tile.
    pos_type = params["pos_emb"][:S] + params["type_emb"][0][None, :]       # (S, H)

    cols = lambda w: w.reshape(L, H, NH, DH).transpose(0, 2, 1, 3)          # (L, NH, H, DH)
    hb = lambda b: b.reshape(L, NH, 1, DH)

    # Pure-constant helpers for the kernel (block-diagonal bias base, CLS row selector).
    row = np.arange(M) // S
    blkdiag = np.where(row[:, None] == row[None, :], 0.0, -2e9).astype(np.float32)
    cls_sel = np.zeros((TB, M), np.float32)
    cls_sel[np.arange(TB), np.arange(TB) * S] = 1.0

    return {
        "blkdiag": jnp.asarray(blkdiag),
        "cls_sel": jnp.asarray(cls_sel, dtype=jnp.bfloat16),
        "pos_type": jnp.tile(pos_type, (TB, 1)),                            # (M, H) f32
        "word_emb": bf(word_pad),
        "emb_ln_g": params["emb_ln_g"].reshape(1, H),
        "emb_ln_b": params["emb_ln_b"].reshape(1, H),
        # 1/sqrt(Dh) folded into the query projection.
        "wq": bf(cols(params["wq"] * inv_sqrt_dh)),
        "wk": bf(cols(params["wk"])),
        "wv": bf(cols(params["wv"])),
        "bq": hb(params["bq"] * inv_sqrt_dh),
        "bk": hb(params["bk"]),
        "bv": hb(params["bv"]),
        "wo": bf(params["wo"].reshape(L, NH, DH, H)),
        "bo": params["bo"].reshape(L, 1, H),
        "ln1_g": params["ln1_g"].reshape(L, 1, H),
        "ln1_b": params["ln1_b"].reshape(L, 1, H),
        "w1": bf(params["w1"]),
        "b1": params["b1"].reshape(L, 1, F),
        "w2": bf(params["w2"]),
        "b2": params["b2"].reshape(L, 1, H),
        "ln2_g": params["ln2_g"].reshape(L, 1, H),
        "ln2_b": params["ln2_b"].reshape(L, 1, H),
        "pool_w": bf(params["pool_w"]),
        "pool_b": params["pool_b"].reshape(1, H),
        "head_wh": params["head_w"][:H, 0].reshape(1, H),
        "head_wx": params["head_w"][H:, 0].reshape(1, 2),
        "head_b": params["head_b"].reshape(1, 1),
    }


# ---------------- forward pass ----------------
def value_regressor_forward(prep, ids, attn_mask, air_date, rounds):
    B, S = ids.shape
    H, F, L, NH, DH = HIDDEN, FFN, N_LAYERS, N_HEADS, HEAD_DIM
    TB = prep["cls_sel"].shape[0]                 # batch tile baked into the prepped constants
    assert B % TB == 0 and TB * S == prep["pos_type"].shape[0]
    M = TB * S
    n_tiles = B // TB

    # Only cheap metadata-level reshapes happen in XLA; the gather is in-kernel.
    ids_flat = ids.reshape(B * S, 1).astype(jnp.int32)
    mask = attn_mask.astype(jnp.float32).reshape(n_tiles, M)
    extras = jnp.stack([air_date.astype(jnp.float32),
                        rounds.astype(jnp.float32)], axis=1)                # (B, 2)

    const = lambda shape: pl.BlockSpec(shape, lambda i: (0,) * len(shape))

    out = pl.pallas_call(
        _fused_forward_kernel,
        out_shape=jax.ShapeDtypeStruct((B, 1), jnp.float32),
        grid=(n_tiles,),
        in_specs=[
            pl.BlockSpec((M, 1), lambda i: (i, 0)),         # ids
            pl.BlockSpec((1, M), lambda i: (i, 0)),         # mask
            pl.BlockSpec((TB, 2), lambda i: (i, 0)),        # extras
            const((M, M)),                                  # block-diag bias base
            const((TB, M)),                                 # CLS selector
            const((M, H)),                                  # pos + type embedding
            const((VOCAB_PAD, H)),                          # word table (bf16)
            const((1, H)), const((1, H)),                   # emb LN g, b
            const((L, NH, H, DH)), const((L, NH, H, DH)), const((L, NH, H, DH)),  # wq wk wv
            const((L, NH, 1, DH)), const((L, NH, 1, DH)), const((L, NH, 1, DH)),  # bq bk bv
            const((L, NH, DH, H)), const((L, 1, H)),        # wo, bo
            const((L, 1, H)), const((L, 1, H)),             # ln1 g, b
            const((L, H, F)), const((L, 1, F)),             # w1, b1
            const((L, F, H)), const((L, 1, H)),             # w2, b2
            const((L, 1, H)), const((L, 1, H)),             # ln2 g, b
            const((H, H)), const((1, H)),                   # pool_w, pool_b
            const((1, H)), const((1, 2)), const((1, 1)),    # head_wh, head_wx, head_b
        ],
        out_specs=pl.BlockSpec((TB, 1), lambda i: (i, 0)),
        compiler_params=pltpu.CompilerParams(
            dimension_semantics=("parallel",)),             # batch tiles shard across TCs (v7x)
    )(ids_flat, mask, extras,
      prep["blkdiag"], prep["cls_sel"], prep["pos_type"], prep["word_emb"],
      prep["emb_ln_g"], prep["emb_ln_b"],
      prep["wq"], prep["wk"], prep["wv"], prep["bq"], prep["bk"], prep["bv"],
      prep["wo"], prep["bo"],
      prep["ln1_g"], prep["ln1_b"], prep["w1"], prep["b1"],
      prep["w2"], prep["b2"], prep["ln2_g"], prep["ln2_b"],
      prep["pool_w"], prep["pool_b"],
      prep["head_wh"], prep["head_wx"], prep["head_b"])

    return out


if __name__ == "__main__":
    key = jax.random.PRNGKey(0)
    pk, ik, ak, rk = jax.random.split(key, 4)

    params = init_params(pk)

    B, S = 2, 8
    # One-time prep (outside jit): bf16 casts, per-head splits, folded scales, constants.
    prep = prepare_params(params, batch_tile=B, seq_len=S)

    ids = jax.random.randint(ik, (B, S), 0, VOCAB, dtype=jnp.int32)
    attn_mask = jnp.array([[1, 1, 1, 1, 1, 1, 1, 1],
                           [1, 1, 1, 1, 1, 0, 0, 0]], dtype=jnp.float32)
    air_date = jax.random.uniform(ak, (B,), dtype=jnp.float32)
    rounds = jax.random.uniform(rk, (B,), dtype=jnp.float32)

    fwd = jax.jit(value_regressor_forward)
    value = fwd(prep, ids, attn_mask, air_date, rounds)
    jax.block_until_ready(value)
    assert value.shape == (B, 1)
    assert bool(jnp.all(jnp.isfinite(value)))
    print("KERNEL_OK")
</pallas_src>

<mosaic_0001>
module attributes {stable_mosaic.version = 11 : i64} {
  func.func @_fused_forward_kernel(%arg0: i32, %arg1: memref<16x1xi32, #tpu.memory_space<vmem>>, %arg2: memref<1x16xf32, #tpu.memory_space<vmem>>, %arg3: memref<2x2xf32, #tpu.memory_space<vmem>>, %arg4: memref<16x16xf32, #tpu.memory_space<vmem>>, %arg5: memref<2x16xbf16, #tpu.memory_space<vmem>>, %arg6: memref<16x32xf32, #tpu.memory_space<vmem>>, %arg7: memref<128x32xbf16, #tpu.memory_space<vmem>>, %arg8: memref<1x32xf32, #tpu.memory_space<vmem>>, %arg9: memref<1x32xf32, #tpu.memory_space<vmem>>, %arg10: memref<2x2x32x16xbf16, #tpu.memory_space<vmem>>, %arg11: memref<2x2x32x16xbf16, #tpu.memory_space<vmem>>, %arg12: memref<2x2x32x16xbf16, #tpu.memory_space<vmem>>, %arg13: memref<2x2x1x16xf32, #tpu.memory_space<vmem>>, %arg14: memref<2x2x1x16xf32, #tpu.memory_space<vmem>>, %arg15: memref<2x2x1x16xf32, #tpu.memory_space<vmem>>, %arg16: memref<2x2x16x32xbf16, #tpu.memory_space<vmem>>, %arg17: memref<2x1x32xf32, #tpu.memory_space<vmem>>, %arg18: memref<2x1x32xf32, #tpu.memory_space<vmem>>, %arg19: memref<2x1x32xf32, #tpu.memory_space<vmem>>, %arg20: memref<2x32x64xbf16, #tpu.memory_space<vmem>>, %arg21: memref<2x1x64xf32, #tpu.memory_space<vmem>>, %arg22: memref<2x64x32xbf16, #tpu.memory_space<vmem>>, %arg23: memref<2x1x32xf32, #tpu.memory_space<vmem>>, %arg24: memref<2x1x32xf32, #tpu.memory_space<vmem>>, %arg25: memref<2x1x32xf32, #tpu.memory_space<vmem>>, %arg26: memref<32x32xbf16, #tpu.memory_space<vmem>>, %arg27: memref<1x32xf32, #tpu.memory_space<vmem>>, %arg28: memref<1x32xf32, #tpu.memory_space<vmem>>, %arg29: memref<1x2xf32, #tpu.memory_space<vmem>>, %arg30: memref<1x1xf32, #tpu.memory_space<vmem>>, %arg31: memref<2x1xf32, #tpu.memory_space<vmem>>) attributes {dimension_semantics = [#tpu.dimension_semantics<parallel>], iteration_bounds = array<i64: 1>, scalar_prefetch = 0 : i64, scratch_operands = 0 : i64, tpu.core_type = #tpu.core_type<tc>, window_params = [{transform_indices = @transform_0, window_bounds = array<i64: 16, 1>}, {transform_indices = @transform_1, window_bounds = array<i64: 1, 16>}, {transform_indices = @transform_2, window_bounds = array<i64: 2, 2>}, {pipeline_mode = #tpu.pipeline_mode<synchronous>, transform_indices = @transform_3, window_bounds = array<i64: 16, 16>}, {pipeline_mode = #tpu.pipeline_mode<synchronous>, transform_indices = @transform_4, window_bounds = array<i64: 2, 16>}, {pipeline_mode = #tpu.pipeline_mode<synchronous>, transform_indices = @transform_5, window_bounds = array<i64: 16, 32>}, {pipeline_mode = #tpu.pipeline_mode<synchronous>, transform_indices = @transform_6, window_bounds = array<i64: 128, 32>}, {pipeline_mode = #tpu.pipeline_mode<synchronous>, transform_indices = @transform_7, window_bounds = array<i64: 1, 32>}, {pipeline_mode = #tpu.pipeline_mode<synchronous>, transform_indices = @transform_8, window_bounds = array<i64: 1, 32>}, {pipeline_mode = #tpu.pipeline_mode<synchronous>, transform_indices = @transform_9, window_bounds = array<i64: 2, 2, 32, 16>}, {pipeline_mode = #tpu.pipeline_mode<synchronous>, transform_indices = @transform_10, window_bounds = array<i64: 2, 2, 32, 16>}, {pipeline_mode = #tpu.pipeline_mode<synchronous>, transform_indices = @transform_11, window_bounds = array<i64: 2, 2, 32, 16>}, {pipeline_mode = #tpu.pipeline_mode<synchronous>, transform_indices = @transform_12, window_bounds = array<i64: 2, 2, 1, 16>}, {pipeline_mode = #tpu.pipeline_mode<synchronous>, transform_indices = @transform_13, window_bounds = array<i64: 2, 2, 1, 16>}, {pipeline_mode = #tpu.pipeline_mode<synchronous>, transform_indices = @transform_14, window_bounds = array<i64: 2, 2, 1, 16>}, {pipeline_mode = #tpu.pipeline_mode<synchronous>, transform_indices = @transform_15, window_bounds = array<i64: 2, 2, 16, 32>}, {pipeline_mode = #tpu.pipeline_mode<synchronous>, transform_indices = @transform_16, window_bounds = array<i64: 2, 1, 32>}, {pipeline_mode = #tpu.pipeline_mode<synchronous>, transform_indices = @transform_17, window_bounds = array<i64: 2, 1, 32>}, {pipeline_mode = #tpu.pipeline_mode<synchronous>, transform_indices = @transform_18, window_bounds = array<i64: 2, 1, 32>}, {pipeline_mode = #tpu.pipeline_mode<synchronous>, transform_indices = @transform_19, window_bounds = array<i64: 2, 32, 64>}, {pipeline_mode = #tpu.pipeline_mode<synchronous>, transform_indices = @transform_20, window_bounds = array<i64: 2, 1, 64>}, {pipeline_mode = #tpu.pipeline_mode<synchronous>, transform_indices = @transform_21, window_bounds = array<i64: 2, 64, 32>}, {pipeline_mode = #tpu.pipeline_mode<synchronous>, transform_indices = @transform_22, window_bounds = array<i64: 2, 1, 32>}, {pipeline_mode = #tpu.pipeline_mode<synchronous>, transform_indices = @transform_23, window_bounds = array<i64: 2, 1, 32>}, {pipeline_mode = #tpu.pipeline_mode<synchronous>, transform_indices = @transform_24, window_bounds = array<i64: 2, 1, 32>}, {pipeline_mode = #tpu.pipeline_mode<synchronous>, transform_indices = @transform_25, window_bounds = array<i64: 32, 32>}, {pipeline_mode = #tpu.pipeline_mode<synchronous>, transform_indices = @transform_26, window_bounds = array<i64: 1, 32>}, {pipeline_mode = #tpu.pipeline_mode<synchronous>, transform_indices = @transform_27, window_bounds = array<i64: 1, 32>}, {pipeline_mode = #tpu.pipeline_mode<synchronous>, transform_indices = @transform_28, window_bounds = array<i64: 1, 2>}, {pipeline_mode = #tpu.pipeline_mode<synchronous>, transform_indices = @transform_29, window_bounds = array<i64: 1, 1>}, {transform_indices = @transform_30, window_bounds = array<i64: 2, 1>}]} {
    %c0 = arith.constant 0 : index
    %c0_0 = arith.constant 0 : index
    %0 = vector.load %arg1[%c0, %c0_0] : memref<16x1xi32, #tpu.memory_space<vmem>>, vector<16x1xi32>
    %1 = tpu.iota {dimensions = array<i32: 1>} : vector<16x128xi32>
    %2 = vector.broadcast %0 : vector<16x1xi32> to vector<16x128xi32>
    %3 = arith.cmpi eq, %1, %2 : vector<16x128xi32>
    %cst = arith.constant 1.000000e+00 : f32
    %cst_1 = arith.constant 0.000000e+00 : f32
    %4 = vector.broadcast %cst : f32 to vector<16x128xf32>
    %5 = vector.broadcast %cst_1 : f32 to vector<16x128xf32>
    %6 = arith.select %3, %4, %5 : vector<16x128xi1>, vector<16x128xf32>
    %7 = arith.truncf %6 : vector<16x128xf32> to vector<16x128xbf16>
    %c0_2 = arith.constant 0 : index
    %c0_3 = arith.constant 0 : index
    %8 = vector.load %arg7[%c0_2, %c0_3] : memref<128x32xbf16, #tpu.memory_space<vmem>>, vector<128x32xbf16>
    %cst_4 = arith.constant dense<0.000000e+00> : vector<16x32xf32>
    %9 = tpu.matmul %7, %8, %cst_4 {dimension_numbers = #tpu.dot_dimension_numbers<[1], [0], [0], [1], [0, 0, 1, 1], [], []>} : vector<16x128xbf16>, vector<128x32xbf16>, vector<16x32xf32> -> vector<16x32xf32>
    %c0_5 = arith.constant 0 : index
    %c0_6 = arith.constant 0 : index
    %10 = vector.load %arg6[%c0_5, %c0_6] : memref<16x32xf32, #tpu.memory_space<vmem>>, vector<16x32xf32>
    %11 = arith.addf %9, %10 : vector<16x32xf32>
    %c0_7 = arith.constant 0 : index
    %c0_8 = arith.constant 0 : index
    %12 = vector.load %arg8[%c0_7, %c0_8] : memref<1x32xf32, #tpu.memory_space<vmem>>, vector<1x32xf32>
    %c0_9 = arith.constant 0 : index
    %c0_10 = arith.constant 0 : index
    %13 = vector.load %arg9[%c0_9, %c0_10] : memref<1x32xf32, #tpu.memory_space<vmem>>, vector<1x32xf32>
    %cst_11 = arith.constant dense<0.000000e+00> : vector<16xf32>
    %14 = vector.multi_reduction <add>, %11, %cst_11 [1] : vector<16x32xf32> to vector<16xf32>
    %15 = vector.shape_cast %14 : vector<16xf32> to vector<16x1xf32>
    %cst_12 = arith.constant 3.200000e+01 : f32
    %16 = vector.broadcast %cst_12 : f32 to vector<16x1xf32>
    %17 = arith.divf %15, %16 : vector<16x1xf32>
    %18 = arith.mulf %11, %11 : vector<16x32xf32>
    %cst_13 = arith.constant dense<0.000000e+00> : vector<16xf32>
    %19 = vector.multi_reduction <add>, %18, %cst_13 [1] : vector<16x32xf32> to vector<16xf32>
    %20 = vector.shape_cast %19 : vector<16xf32> to vector<16x1xf32>
    %cst_14 = arith.constant 3.200000e+01 : f32
    %21 = vector.broadcast %cst_14 : f32 to vector<16x1xf32>
    %22 = arith.divf %20, %21 : vector<16x1xf32>
    %23 = arith.mulf %17, %17 : vector<16x1xf32>
    %24 = arith.subf %22, %23 : vector<16x1xf32>
    %25 = vector.broadcast %17 : vector<16x1xf32> to vector<16x32xf32>
    %26 = arith.subf %11, %25 : vector<16x32xf32>
    %cst_15 = arith.constant 9.99999996E-13 : f32
    %27 = vector.broadcast %cst_15 : f32 to vector<16x1xf32>
    %28 = arith.addf %24, %27 : vector<16x1xf32>
    %29 = math.rsqrt %28 : vector<16x1xf32>
    %30 = vector.broadcast %29 : vector<16x1xf32> to vector<16x32xf32>
    %31 = arith.mulf %26, %30 : vector<16x32xf32>
    %32 = vector.broadcast %12 : vector<1x32xf32> to vector<16x32xf32>
    %33 = arith.mulf %31, %32 : vector<16x32xf32>
    %34 = vector.broadcast %13 : vector<1x32xf32> to vector<16x32xf32>
    %35 = arith.addf %33, %34 : vector<16x32xf32>
    %c0_16 = arith.constant 0 : index
    %c0_17 = arith.constant 0 : index
    %36 = vector.load %arg4[%c0_16, %c0_17] : memref<16x16xf32, #tpu.memory_space<vmem>>, vector<16x16xf32>
    %c0_18 = arith.constant 0 : index
    %c0_19 = arith.constant 0 : index
    %37 = vector.load %arg2[%c0_18, %c0_19] : memref<1x16xf32, #tpu.memory_space<vmem>>, vector<1x16xf32>
    %cst_20 = arith.constant 1.000000e+00 : f32
    %38 = vector.broadcast %cst_20 : f32 to vector<1x16xf32>
    %39 = arith.subf %37, %38 : vector<1x16xf32>
    %cst_21 = arith.constant 1.000000e+09 : f32
    %40 = vector.broadcast %cst_21 : f32 to vector<1x16xf32>
    %41 = arith.mulf %39, %40 : vector<1x16xf32>
    %42 = vector.broadcast %41 : vector<1x16xf32> to vector<16x16xf32>
    %43 = arith.addf %36, %42 : vector<16x16xf32>
    %44 = arith.truncf %35 : vector<16x32xf32> to vector<16x32xbf16>
    %cst_22 = arith.constant 0.000000e+00 : f32
    %45 = vector.broadcast %cst_22 : f32 to vector<16x32xf32>
    %c0_23 = arith.constant 0 : index
    %c0_24 = arith.constant 0 : index
    %c0_25 = arith.constant 0 : index
    %c0_26 = arith.constant 0 : index
    %46 = vector.load %arg10[%c0_23, %c0_24, %c0_25, %c0_26] : memref<2x2x32x16xbf16, #tpu.memory_space<vmem>>, vector<1x1x32x16xbf16>
    %47 = vector.shape_cast %46 : vector<1x1x32x16xbf16> to vector<32x16xbf16>
    %cst_27 = arith.constant dense<0.000000e+00> : vector<16x16xf32>
    %48 = tpu.matmul %44, %47, %cst_27 {dimension_numbers = #tpu.dot_dimension_numbers<[1], [0], [0], [1], [0, 0, 1, 1], [], []>} : vector<16x32xbf16>, vector<32x16xbf16>, vector<16x16xf32> -> vector<16x16xf32>
    %c0_28 = arith.constant 0 : index
    %c0_29 = arith.constant 0 : index
    %c0_30 = arith.constant 0 : index
    %c0_31 = arith.constant 0 : index
    %49 = vector.load %arg13[%c0_28, %c0_29, %c0_30, %c0_31] : memref<2x2x1x16xf32, #tpu.memory_space<vmem>>, vector<1x1x1x16xf32>
    %50 = vector.shape_cast %49 : vector<1x1x1x16xf32> to vector<1x16xf32>
    %51 = vector.broadcast %50 : vector<1x16xf32> to vector<16x16xf32>
    %52 = arith.addf %48, %51 : vector<16x16xf32>
    %c0_32 = arith.constant 0 : index
    %c0_33 = arith.constant 0 : index
    %c0_34 = arith.constant 0 : index
    %c0_35 = arith.constant 0 : index
    %53 = vector.load %arg11[%c0_32, %c0_33, %c0_34, %c0_35] : memref<2x2x32x16xbf16, #tpu.memory_space<vmem>>, vector<1x1x32x16xbf16>
    %54 = vector.shape_cast %53 : vector<1x1x32x16xbf16> to vector<32x16xbf16>
    %cst_36 = arith.constant dense<0.000000e+00> : vector<16x16xf32>
    %55 = tpu.matmul %44, %54, %cst_36 {dimension_numbers = #tpu.dot_dimension_numbers<[1], [0], [0], [1], [0, 0, 1, 1], [], []>} : vector<16x32xbf16>, vector<32x16xbf16>, vector<16x16xf32> -> vector<16x16xf32>
    %c0_37 = arith.constant 0 : index
    %c0_38 = arith.constant 0 : index
    %c0_39 = arith.constant 0 : index
    %c0_40 = arith.constant 0 : index
    %56 = vector.load %arg14[%c0_37, %c0_38, %c0_39, %c0_40] : memref<2x2x1x16xf32, #tpu.memory_space<vmem>>, vector<1x1x1x16xf32>
    %57 = vector.shape_cast %56 : vector<1x1x1x16xf32> to vector<1x16xf32>
    %58 = vector.broadcast %57 : vector<1x16xf32> to vector<16x16xf32>
    %59 = arith.addf %55, %58 : vector<16x16xf32>
    %c0_41 = arith.constant 0 : index
    %c0_42 = arith.constant 0 : index
    %c0_43 = arith.constant 0 : index
    %c0_44 = arith.constant 0 : index
    %60 = vector.load %arg12[%c0_41, %c0_42, %c0_43, %c0_44] : memref<2x2x32x16xbf16, #tpu.memory_space<vmem>>, vector<1x1x32x16xbf16>
    %61 = vector.shape_cast %60 : vector<1x1x32x16xbf16> to vector<32x16xbf16>
    %cst_45 = arith.constant dense<0.000000e+00> : vector<16x16xf32>
    %62 = tpu.matmul %44, %61, %cst_45 {dimension_numbers = #tpu.dot_dimension_numbers<[1], [0], [0], [1], [0, 0, 1, 1], [], []>} : vector<16x32xbf16>, vector<32x16xbf16>, vector<16x16xf32> -> vector<16x16xf32>
    %c0_46 = arith.constant 0 : index
    %c0_47 = arith.constant 0 : index
    %c0_48 = arith.constant 0 : index
    %c0_49 = arith.constant 0 : index
    %63 = vector.load %arg15[%c0_46, %c0_47, %c0_48, %c0_49] : memref<2x2x1x16xf32, #tpu.memory_space<vmem>>, vector<1x1x1x16xf32>
    %64 = vector.shape_cast %63 : vector<1x1x1x16xf32> to vector<1x16xf32>
    %65 = vector.broadcast %64 : vector<1x16xf32> to vector<16x16xf32>
    %66 = arith.addf %62, %65 : vector<16x16xf32>
    %67 = arith.truncf %52 : vector<16x16xf32> to vector<16x16xbf16>
    %68 = arith.truncf %59 : vector<16x16xf32> to vector<16x16xbf16>
    "tpu.trace_start"() <{level = 10 : i32, message = "md,nd->mn"}> : () -> ()
    %cst_50 = arith.constant dense<0.000000e+00> : vector<16x16xf32>
    %69 = tpu.matmul %67, %68, %cst_50 {dimension_numbers = #tpu.dot_dimension_numbers<[1], [1], [0], [0], [0, 0, 1, 0], [], []>} : vector<16x16xbf16>, vector<16x16xbf16>, vector<16x16xf32> -> vector<16x16xf32>
    "tpu.trace_stop"() : () -> ()
    %70 = arith.addf %69, %43 : vector<16x16xf32>
    %cst_51 = arith.constant dense<0xFF800000> : vector<16xf32>
    %71 = vector.multi_reduction <maximumf>, %70, %cst_51 [1] : vector<16x16xf32> to vector<16xf32>
    %72 = vector.shape_cast %71 : vector<16xf32> to vector<16x1xf32>
    %73 = vector.broadcast %72 : vector<16x1xf32> to vector<16x16xf32>
    %74 = arith.subf %70, %73 : vector<16x16xf32>
    %75 = math.exp %74 : vector<16x16xf32>
    %cst_52 = arith.constant dense<0.000000e+00> : vector<16xf32>
    %76 = vector.multi_reduction <add>, %75, %cst_52 [1] : vector<16x16xf32> to vector<16xf32>
    %77 = vector.shape_cast %76 : vector<16xf32> to vector<16x1xf32>
    %78 = tpu.reciprocal %77 {approx = true} : vector<16x1xf32> -> vector<16x1xf32>
    %79 = vector.broadcast %78 : vector<16x1xf32> to vector<16x16xf32>
    %80 = arith.mulf %75, %79 : vector<16x16xf32>
    %81 = arith.truncf %80 : vector<16x16xf32> to vector<16x16xbf16>
    %82 = arith.truncf %66 : vector<16x16xf32> to vector<16x16xbf16>
    %cst_53 = arith.constant dense<0.000000e+00> : vector<16x16xf32>
    %83 = tpu.matmul %81, %82, %cst_53 {dimension_numbers = #tpu.dot_dimension_numbers<[1], [0], [0], [1], [0, 0, 1, 1], [], []>} : vector<16x16xbf16>, vector<16x16xbf16>, vector<16x16xf32> -> vector<16x16xf32>
    %84 = arith.truncf %83 : vector<16x16xf32> to vector<16x16xbf16>
    %c0_54 = arith.constant 0 : index
    %c0_55 = arith.constant 0 : index
    %c0_56 = arith.constant 0 : index
    %c0_57 = arith.constant 0 : index
    %85 = vector.load %arg16[%c0_54, %c0_55, %c0_56, %c0_57] : memref<2x2x16x32xbf16, #tpu.memory_space<vmem>>, vector<1x1x16x32xbf16>
    %86 = vector.shape_cast %85 : vector<1x1x16x32xbf16> to vector<16x32xbf16>
    %cst_58 = arith.constant dense<0.000000e+00> : vector<16x32xf32>
    %87 = tpu.matmul %84, %86, %cst_58 {dimension_numbers = #tpu.dot_dimension_numbers<[1], [0], [0], [1], [0, 0, 1, 1], [], []>} : vector<16x16xbf16>, vector<16x32xbf16>, vector<16x32xf32> -> vector<16x32xf32>
    %88 = arith.addf %45, %87 : vector<16x32xf32>
    %c0_59 = arith.constant 0 : index
    %c1 = arith.constant 1 : index
    %c0_60 = arith.constant 0 : index
    %c0_61 = arith.constant 0 : index
    %89 = vector.load %arg10[%c0_59, %c1, %c0_60, %c0_61] : memref<2x2x32x16xbf16, #tpu.memory_space<vmem>>, vector<1x1x32x16xbf16>
    %90 = vector.shape_cast %89 : vector<1x1x32x16xbf16> to vector<32x16xbf16>
    %cst_62 = arith.constant dense<0.000000e+00> : vector<16x16xf32>
    %91 = tpu.matmul %44, %90, %cst_62 {dimension_numbers = #tpu.dot_dimension_numbers<[1], [0], [0], [1], [0, 0, 1, 1], [], []>} : vector<16x32xbf16>, vector<32x16xbf16>, vector<16x16xf32> -> vector<16x16xf32>
    %c0_63 = arith.constant 0 : index
    %c1_64 = arith.constant 1 : index
    %c0_65 = arith.constant 0 : index
    %c0_66 = arith.constant 0 : index
    %92 = vector.load %arg13[%c0_63, %c1_64, %c0_65, %c0_66] : memref<2x2x1x16xf32, #tpu.memory_space<vmem>>, vector<1x1x1x16xf32>
    %93 = vector.shape_cast %92 : vector<1x1x1x16xf32> to vector<1x16xf32>
    %94 = vector.broadcast %93 : vector<1x16xf32> to vector<16x16xf32>
    %95 = arith.addf %91, %94 : vector<16x16xf32>
    %c0_67 = arith.constant 0 : index
    %c1_68 = arith.constant 1 : index
    %c0_69 = arith.constant 0 : index
    %c0_70 = arith.constant 0 : index
    %96 = vector.load %arg11[%c0_67, %c1_68, %c0_69, %c0_70] : memref<2x2x32x16xbf16, #tpu.memory_space<vmem>>, vector<1x1x32x16xbf16>
    %97 = vector.shape_cast %96 : vector<1x1x32x16xbf16> to vector<32x16xbf16>
    %cst_71 = arith.constant dense<0.000000e+00> : vector<16x16xf32>
    %98 = tpu.matmul %44, %97, %cst_71 {dimension_numbers = #tpu.dot_dimension_numbers<[1], [0], [0], [1], [0, 0, 1, 1], [], []>} : vector<16x32xbf16>, vector<32x16xbf16>, vector<16x16xf32> -> vector<16x16xf32>
    %c0_72 = arith.constant 0 : index
    %c1_73 = arith.constant 1 : index
    %c0_74 = arith.constant 0 : index
    %c0_75 = arith.constant 0 : index
    %99 = vector.load %arg14[%c0_72, %c1_73, %c0_74, %c0_75] : memref<2x2x1x16xf32, #tpu.memory_space<vmem>>, vector<1x1x1x16xf32>
    %100 = vector.shape_cast %99 : vector<1x1x1x16xf32> to vector<1x16xf32>
    %101 = vector.broadcast %100 : vector<1x16xf32> to vector<16x16xf32>
    %102 = arith.addf %98, %101 : vector<16x16xf32>
    %c0_76 = arith.constant 0 : index
    %c1_77 = arith.constant 1 : index
    %c0_78 = arith.constant 0 : index
    %c0_79 = arith.constant 0 : index
    %103 = vector.load %arg12[%c0_76, %c1_77, %c0_78, %c0_79] : memref<2x2x32x16xbf16, #tpu.memory_space<vmem>>, vector<1x1x32x16xbf16>
    %104 = vector.shape_cast %103 : vector<1x1x32x16xbf16> to vector<32x16xbf16>
    %cst_80 = arith.constant dense<0.000000e+00> : vector<16x16xf32>
    %105 = tpu.matmul %44, %104, %cst_80 {dimension_numbers = #tpu.dot_dimension_numbers<[1], [0], [0], [1], [0, 0, 1, 1], [], []>} : vector<16x32xbf16>, vector<32x16xbf16>, vector<16x16xf32> -> vector<16x16xf32>
    %c0_81 = arith.constant 0 : index
    %c1_82 = arith.constant 1 : index
    %c0_83 = arith.constant 0 : index
    %c0_84 = arith.constant 0 : index
    %106 = vector.load %arg15[%c0_81, %c1_82, %c0_83, %c0_84] : memref<2x2x1x16xf32, #tpu.memory_space<vmem>>, vector<1x1x1x16xf32>
    %107 = vector.shape_cast %106 : vector<1x1x1x16xf32> to vector<1x16xf32>
    %108 = vector.broadcast %107 : vector<1x16xf32> to vector<16x16xf32>
    %109 = arith.addf %105, %108 : vector<16x16xf32>
    %110 = arith.truncf %95 : vector<16x16xf32> to vector<16x16xbf16>
    %111 = arith.truncf %102 : vector<16x16xf32> to vector<16x16xbf16>
    "tpu.trace_start"() <{level = 10 : i32, message = "md,nd->mn"}> : () -> ()
    %cst_85 = arith.constant dense<0.000000e+00> : vector<16x16xf32>
    %112 = tpu.matmul %110, %111, %cst_85 {dimension_numbers = #tpu.dot_dimension_numbers<[1], [1], [0], [0], [0, 0, 1, 0], [], []>} : vector<16x16xbf16>, vector<16x16xbf16>, vector<16x16xf32> -> vector<16x16xf32>
    "tpu.trace_stop"() : () -> ()
    %113 = arith.addf %112, %43 : vector<16x16xf32>
    %cst_86 = arith.constant dense<0xFF800000> : vector<16xf32>
    %114 = vector.multi_reduction <maximumf>, %113, %cst_86 [1] : vector<16x16xf32> to vector<16xf32>
    %115 = vector.shape_cast %114 : vector<16xf32> to vector<16x1xf32>
    %116 = vector.broadcast %115 : vector<16x1xf32> to vector<16x16xf32>
    %117 = arith.subf %113, %116 : vector<16x16xf32>
    %118 = math.exp %117 : vector<16x16xf32>
    %cst_87 = arith.constant dense<0.000000e+00> : vector<16xf32>
    %119 = vector.multi_reduction <add>, %118, %cst_87 [1] : vector<16x16xf32> to vector<16xf32>
    %120 = vector.shape_cast %119 : vector<16xf32> to vector<16x1xf32>
    %121 = tpu.reciprocal %120 {approx = true} : vector<16x1xf32> -> vector<16x1xf32>
    %122 = vector.broadcast %121 : vector<16x1xf32> to vector<16x16xf32>
    %123 = arith.mulf %118, %122 : vector<16x16xf32>
    %124 = arith.truncf %123 : vector<16x16xf32> to vector<16x16xbf16>
    %125 = arith.truncf %109 : vector<16x16xf32> to vector<16x16xbf16>
    %cst_88 = arith.constant dense<0.000000e+00> : vector<16x16xf32>
    %126 = tpu.matmul %124, %125, %cst_88 {dimension_numbers = #tpu.dot_dimension_numbers<[1], [0], [0], [1], [0, 0, 1, 1], [], []>} : vector<16x16xbf16>, vector<16x16xbf16>, vector<16x16xf32> -> vector<16x16xf32>
    %127 = arith.truncf %126 : vector<16x16xf32> to vector<16x16xbf16>
    %c0_89 = arith.constant 0 : index
    %c1_90 = arith.constant 1 : index
    %c0_91 = arith.constant 0 : index
    %c0_92 = arith.constant 0 : index
    %128 = vector.load %arg16[%c0_89, %c1_90, %c0_91, %c0_92] : memref<2x2x16x32xbf16, #tpu.memory_space<vmem>>, vector<1x1x16x32xbf16>
    %129 = vector.shape_cast %128 : vector<1x1x16x32xbf16> to vector<16x32xbf16>
    %cst_93 = arith.constant dense<0.000000e+00> : vector<16x32xf32>
    %130 = tpu.matmul %127, %129, %cst_93 {dimension_numbers = #tpu.dot_dimension_numbers<[1], [0], [0], [1], [0, 0, 1, 1], [], []>} : vector<16x16xbf16>, vector<16x32xbf16>, vector<16x32xf32> -> vector<16x32xf32>
    %131 = arith.addf %88, %130 : vector<16x32xf32>
    %c0_94 = arith.constant 0 : index
    %c0_95 = arith.constant 0 : index
    %c0_96 = arith.constant 0 : index
    %132 = vector.load %arg17[%c0_94, %c0_95, %c0_96] : memref<2x1x32xf32, #tpu.memory_space<vmem>>, vector<1x1x32xf32>
    %133 = vector.shape_cast %132 : vector<1x1x32xf32> to vector<1x32xf32>
    %134 = vector.broadcast %133 : vector<1x32xf32> to vector<16x32xf32>
    %135 = arith.addf %131, %134 : vector<16x32xf32>
    %136 = arith.addf %135, %35 : vector<16x32xf32>
    %c0_97 = arith.constant 0 : index
    %c0_98 = arith.constant 0 : index
    %c0_99 = arith.constant 0 : index
    %137 = vector.load %arg18[%c0_97, %c0_98, %c0_99] : memref<2x1x32xf32, #tpu.memory_space<vmem>>, vector<1x1x32xf32>
    %138 = vector.shape_cast %137 : vector<1x1x32xf32> to vector<1x32xf32>
    %c0_100 = arith.constant 0 : index
    %c0_101 = arith.constant 0 : index
    %c0_102 = arith.constant 0 : index
    %139 = vector.load %arg19[%c0_100, %c0_101, %c0_102] : memref<2x1x32xf32, #tpu.memory_space<vmem>>, vector<1x1x32xf32>
    %140 = vector.shape_cast %139 : vector<1x1x32xf32> to vector<1x32xf32>
    %cst_103 = arith.constant dense<0.000000e+00> : vector<16xf32>
    %141 = vector.multi_reduction <add>, %136, %cst_103 [1] : vector<16x32xf32> to vector<16xf32>
    %142 = vector.shape_cast %141 : vector<16xf32> to vector<16x1xf32>
    %cst_104 = arith.constant 3.200000e+01 : f32
    %143 = vector.broadcast %cst_104 : f32 to vector<16x1xf32>
    %144 = arith.divf %142, %143 : vector<16x1xf32>
    %145 = arith.mulf %136, %136 : vector<16x32xf32>
    %cst_105 = arith.constant dense<0.000000e+00> : vector<16xf32>
    %146 = vector.multi_reduction <add>, %145, %cst_105 [1] : vector<16x32xf32> to vector<16xf32>
    %147 = vector.shape_cast %146 : vector<16xf32> to vector<16x1xf32>
    %cst_106 = arith.constant 3.200000e+01 : f32
    %148 = vector.broadcast %cst_106 : f32 to vector<16x1xf32>
    %149 = arith.divf %147, %148 : vector<16x1xf32>
    %150 = arith.mulf %144, %144 : vector<16x1xf32>
    %151 = arith.subf %149, %150 : vector<16x1xf32>
    %152 = vector.broadcast %144 : vector<16x1xf32> to vector<16x32xf32>
    %153 = arith.subf %136, %152 : vector<16x32xf32>
    %cst_107 = arith.constant 9.99999996E-13 : f32
    %154 = vector.broadcast %cst_107 : f32 to vector<16x1xf32>
    %155 = arith.addf %151, %154 : vector<16x1xf32>
    %156 = math.rsqrt %155 : vector<16x1xf32>
    %157 = vector.broadcast %156 : vector<16x1xf32> to vector<16x32xf32>
    %158 = arith.mulf %153, %157 : vector<16x32xf32>
    %159 = vector.broadcast %138 : vector<1x32xf32> to vector<16x32xf32>
    %160 = arith.mulf %158, %159 : vector<16x32xf32>
    %161 = vector.broadcast %140 : vector<1x32xf32> to vector<16x32xf32>
    %162 = arith.addf %160, %161 : vector<16x32xf32>
    %163 = arith.truncf %162 : vector<16x32xf32> to vector<16x32xbf16>
    %c0_108 = arith.constant 0 : index
    %c0_109 = arith.constant 0 : index
    %c0_110 = arith.constant 0 : index
    %164 = vector.load %arg20[%c0_108, %c0_109, %c0_110] : memref<2x32x64xbf16, #tpu.memory_space<vmem>>, vector<1x32x64xbf16>
    %165 = vector.shape_cast %164 : vector<1x32x64xbf16> to vector<32x64xbf16>
    %cst_111 = arith.constant dense<0.000000e+00> : vector<16x64xf32>
    %166 = tpu.matmul %163, %165, %cst_111 {dimension_numbers = #tpu.dot_dimension_numbers<[1], [0], [0], [1], [0, 0, 1, 1], [], []>} : vector<16x32xbf16>, vector<32x64xbf16>, vector<16x64xf32> -> vector<16x64xf32>
    %c0_112 = arith.constant 0 : index
    %c0_113 = arith.constant 0 : index
    %c0_114 = arith.constant 0 : index
    %167 = vector.load %arg21[%c0_112, %c0_113, %c0_114] : memref<2x1x64xf32, #tpu.memory_space<vmem>>, vector<1x1x64xf32>
    %168 = vector.shape_cast %167 : vector<1x1x64xf32> to vector<1x64xf32>
    %169 = vector.broadcast %168 : vector<1x64xf32> to vector<16x64xf32>
    %170 = arith.addf %166, %169 : vector<16x64xf32>
    %171 = arith.mulf %170, %170 : vector<16x64xf32>
    %172 = arith.mulf %170, %171 : vector<16x64xf32>
    %cst_115 = arith.constant 4.471500e-02 : f32
    %173 = vector.broadcast %cst_115 : f32 to vector<16x64xf32>
    %174 = arith.mulf %173, %172 : vector<16x64xf32>
    %175 = arith.addf %170, %174 : vector<16x64xf32>
    %cst_116 = arith.constant 0.797884583 : f32
    %176 = vector.broadcast %cst_116 : f32 to vector<16x64xf32>
    %177 = arith.mulf %176, %175 : vector<16x64xf32>
    %178 = math.tanh %177 : vector<16x64xf32>
    %cst_117 = arith.constant 1.000000e+00 : f32
    %179 = vector.broadcast %cst_117 : f32 to vector<16x64xf32>
    %180 = arith.addf %179, %178 : vector<16x64xf32>
    %cst_118 = arith.constant 5.000000e-01 : f32
    %181 = vector.broadcast %cst_118 : f32 to vector<16x64xf32>
    %182 = arith.mulf %181, %180 : vector<16x64xf32>
    %183 = arith.mulf %170, %182 : vector<16x64xf32>
    %184 = arith.truncf %183 : vector<16x64xf32> to vector<16x64xbf16>
    %c0_119 = arith.constant 0 : index
    %c0_120 = arith.constant 0 : index
    %c0_121 = arith.constant 0 : index
    %185 = vector.load %arg22[%c0_119, %c0_120, %c0_121] : memref<2x64x32xbf16, #tpu.memory_space<vmem>>, vector<1x64x32xbf16>
    %186 = vector.shape_cast %185 : vector<1x64x32xbf16> to vector<64x32xbf16>
    %cst_122 = arith.constant dense<0.000000e+00> : vector<16x32xf32>
    %187 = tpu.matmul %184, %186, %cst_122 {dimension_numbers = #tpu.dot_dimension_numbers<[1], [0], [0], [1], [0, 0, 1, 1], [], []>} : vector<16x64xbf16>, vector<64x32xbf16>, vector<16x32xf32> -> vector<16x32xf32>
    %c0_123 = arith.constant 0 : index
    %c0_124 = arith.constant 0 : index
    %c0_125 = arith.constant 0 : index
    %188 = vector.load %arg23[%c0_123, %c0_124, %c0_125] : memref<2x1x32xf32, #tpu.memory_space<vmem>>, vector<1x1x32xf32>
    %189 = vector.shape_cast %188 : vector<1x1x32xf32> to vector<1x32xf32>
    %190 = vector.broadcast %189 : vector<1x32xf32> to vector<16x32xf32>
    %191 = arith.addf %187, %190 : vector<16x32xf32>
    %192 = arith.addf %191, %162 : vector<16x32xf32>
    %c0_126 = arith.constant 0 : index
    %c0_127 = arith.constant 0 : index
    %c0_128 = arith.constant 0 : index
    %193 = vector.load %arg24[%c0_126, %c0_127, %c0_128] : memref<2x1x32xf32, #tpu.memory_space<vmem>>, vector<1x1x32xf32>
    %194 = vector.shape_cast %193 : vector<1x1x32xf32> to vector<1x32xf32>
    %c0_129 = arith.constant 0 : index
    %c0_130 = arith.constant 0 : index
    %c0_131 = arith.constant 0 : index
    %195 = vector.load %arg25[%c0_129, %c0_130, %c0_131] : memref<2x1x32xf32, #tpu.memory_space<vmem>>, vector<1x1x32xf32>
    %196 = vector.shape_cast %195 : vector<1x1x32xf32> to vector<1x32xf32>
    %cst_132 = arith.constant dense<0.000000e+00> : vector<16xf32>
    %197 = vector.multi_reduction <add>, %192, %cst_132 [1] : vector<16x32xf32> to vector<16xf32>
    %198 = vector.shape_cast %197 : vector<16xf32> to vector<16x1xf32>
    %cst_133 = arith.constant 3.200000e+01 : f32
    %199 = vector.broadcast %cst_133 : f32 to vector<16x1xf32>
    %200 = arith.divf %198, %199 : vector<16x1xf32>
    %201 = arith.mulf %192, %192 : vector<16x32xf32>
    %cst_134 = arith.constant dense<0.000000e+00> : vector<16xf32>
    %202 = vector.multi_reduction <add>, %201, %cst_134 [1] : vector<16x32xf32> to vector<16xf32>
    %203 = vector.shape_cast %202 : vector<16xf32> to vector<16x1xf32>
    %cst_135 = arith.constant 3.200000e+01 : f32
    %204 = vector.broadcast %cst_135 : f32 to vector<16x1xf32>
    %205 = arith.divf %203, %204 : vector<16x1xf32>
    %206 = arith.mulf %200, %200 : vector<16x1xf32>
    %207 = arith.subf %205, %206 : vector<16x1xf32>
    %208 = vector.broadcast %200 : vector<16x1xf32> to vector<16x32xf32>
    %209 = arith.subf %192, %208 : vector<16x32xf32>
    %cst_136 = arith.constant 9.99999996E-13 : f32
    %210 = vector.broadcast %cst_136 : f32 to vector<16x1xf32>
    %211 = arith.addf %207, %210 : vector<16x1xf32>
    %212 = math.rsqrt %211 : vector<16x1xf32>
    %213 = vector.broadcast %212 : vector<16x1xf32> to vector<16x32xf32>
    %214 = arith.mulf %209, %213 : vector<16x32xf32>
    %215 = vector.broadcast %194 : vector<1x32xf32> to vector<16x32xf32>
    %216 = arith.mulf %214, %215 : vector<16x32xf32>
    %217 = vector.broadcast %196 : vector<1x32xf32> to vector<16x32xf32>
    %218 = arith.addf %216, %217 : vector<16x32xf32>
    %219 = arith.truncf %218 : vector<16x32xf32> to vector<16x32xbf16>
    %cst_137 = arith.constant 0.000000e+00 : f32
    %220 = vector.broadcast %cst_137 : f32 to vector<16x32xf32>
    %c1_138 = arith.constant 1 : index
    %c0_139 = arith.constant 0 : index
    %c0_140 = arith.constant 0 : index
    %c0_141 = arith.constant 0 : index
    %221 = vector.load %arg10[%c1_138, %c0_139, %c0_140, %c0_141] : memref<2x2x32x16xbf16, #tpu.memory_space<vmem>>, vector<1x1x32x16xbf16>
    %222 = vector.shape_cast %221 : vector<1x1x32x16xbf16> to vector<32x16xbf16>
    %cst_142 = arith.constant dense<0.000000e+00> : vector<16x16xf32>
    %223 = tpu.matmul %219, %222, %cst_142 {dimension_numbers = #tpu.dot_dimension_numbers<[1], [0], [0], [1], [0, 0, 1, 1], [], []>} : vector<16x32xbf16>, vector<32x16xbf16>, vector<16x16xf32> -> vector<16x16xf32>
    %c1_143 = arith.constant 1 : index
    %c0_144 = arith.constant 0 : index
    %c0_145 = arith.constant 0 : index
    %c0_146 = arith.constant 0 : index
    %224 = vector.load %arg13[%c1_143, %c0_144, %c0_145, %c0_146] : memref<2x2x1x16xf32, #tpu.memory_space<vmem>>, vector<1x1x1x16xf32>
    %225 = vector.shape_cast %224 : vector<1x1x1x16xf32> to vector<1x16xf32>
    %226 = vector.broadcast %225 : vector<1x16xf32> to vector<16x16xf32>
    %227 = arith.addf %223, %226 : vector<16x16xf32>
    %c1_147 = arith.constant 1 : index
    %c0_148 = arith.constant 0 : index
    %c0_149 = arith.constant 0 : index
    %c0_150 = arith.constant 0 : index
    %228 = vector.load %arg11[%c1_147, %c0_148, %c0_149, %c0_150] : memref<2x2x32x16xbf16, #tpu.memory_space<vmem>>, vector<1x1x32x16xbf16>
    %229 = vector.shape_cast %228 : vector<1x1x32x16xbf16> to vector<32x16xbf16>
    %cst_151 = arith.constant dense<0.000000e+00> : vector<16x16xf32>
    %230 = tpu.matmul %219, %229, %cst_151 {dimension_numbers = #tpu.dot_dimension_numbers<[1], [0], [0], [1], [0, 0, 1, 1], [], []>} : vector<16x32xbf16>, vector<32x16xbf16>, vector<16x16xf32> -> vector<16x16xf32>
    %c1_152 = arith.constant 1 : index
    %c0_153 = arith.constant 0 : index
    %c0_154 = arith.constant 0 : index
    %c0_155 = arith.constant 0 : index
    %231 = vector.load %arg14[%c1_152, %c0_153, %c0_154, %c0_155] : memref<2x2x1x16xf32, #tpu.memory_space<vmem>>, vector<1x1x1x16xf32>
    %232 = vector.shape_cast %231 : vector<1x1x1x16xf32> to vector<1x16xf32>
    %233 = vector.broadcast %232 : vector<1x16xf32> to vector<16x16xf32>
    %234 = arith.addf %230, %233 : vector<16x16xf32>
    %c1_156 = arith.constant 1 : index
    %c0_157 = arith.constant 0 : index
    %c0_158 = arith.constant 0 : index
    %c0_159 = arith.constant 0 : index
    %235 = vector.load %arg12[%c1_156, %c0_157, %c0_158, %c0_159] : memref<2x2x32x16xbf16, #tpu.memory_space<vmem>>, vector<1x1x32x16xbf16>
    %236 = vector.shape_cast %235 : vector<1x1x32x16xbf16> to vector<32x16xbf16>
    %cst_160 = arith.constant dense<0.000000e+00> : vector<16x16xf32>
    %237 = tpu.matmul %219, %236, %cst_160 {dimension_numbers = #tpu.dot_dimension_numbers<[1], [0], [0], [1], [0, 0, 1, 1], [], []>} : vector<16x32xbf16>, vector<32x16xbf16>, vector<16x16xf32> -> vector<16x16xf32>
    %c1_161 = arith.constant 1 : index
    %c0_162 = arith.constant 0 : index
    %c0_163 = arith.constant 0 : index
    %c0_164 = arith.constant 0 : index
    %238 = vector.load %arg15[%c1_161, %c0_162, %c0_163, %c0_164] : memref<2x2x1x16xf32, #tpu.memory_space<vmem>>, vector<1x1x1x16xf32>
    %239 = vector.shape_cast %238 : vector<1x1x1x16xf32> to vector<1x16xf32>
    %240 = vector.broadcast %239 : vector<1x16xf32> to vector<16x16xf32>
    %241 = arith.addf %237, %240 : vector<16x16xf32>
    %242 = arith.truncf %227 : vector<16x16xf32> to vector<16x16xbf16>
    %243 = arith.truncf %234 : vector<16x16xf32> to vector<16x16xbf16>
    "tpu.trace_start"() <{level = 10 : i32, message = "md,nd->mn"}> : () -> ()
    %cst_165 = arith.constant dense<0.000000e+00> : vector<16x16xf32>
    %244 = tpu.matmul %242, %243, %cst_165 {dimension_numbers = #tpu.dot_dimension_numbers<[1], [1], [0], [0], [0, 0, 1, 0], [], []>} : vector<16x16xbf16>, vector<16x16xbf16>, vector<16x16xf32> -> vector<16x16xf32>
    "tpu.trace_stop"() : () -> ()
    %245 = arith.addf %244, %43 : vector<16x16xf32>
    %cst_166 = arith.constant dense<0xFF800000> : vector<16xf32>
    %246 = vector.multi_reduction <maximumf>, %245, %cst_166 [1] : vector<16x16xf32> to vector<16xf32>
    %247 = vector.shape_cast %246 : vector<16xf32> to vector<16x1xf32>
    %248 = vector.broadcast %247 : vector<16x1xf32> to vector<16x16xf32>
    %249 = arith.subf %245, %248 : vector<16x16xf32>
    %250 = math.exp %249 : vector<16x16xf32>
    %cst_167 = arith.constant dense<0.000000e+00> : vector<16xf32>
    %251 = vector.multi_reduction <add>, %250, %cst_167 [1] : vector<16x16xf32> to vector<16xf32>
    %252 = vector.shape_cast %251 : vector<16xf32> to vector<16x1xf32>
    %253 = tpu.reciprocal %252 {approx = true} : vector<16x1xf32> -> vector<16x1xf32>
    %254 = vector.broadcast %253 : vector<16x1xf32> to vector<16x16xf32>
    %255 = arith.mulf %250, %254 : vector<16x16xf32>
    %256 = arith.truncf %255 : vector<16x16xf32> to vector<16x16xbf16>
    %257 = arith.truncf %241 : vector<16x16xf32> to vector<16x16xbf16>
    %cst_168 = arith.constant dense<0.000000e+00> : vector<16x16xf32>
    %258 = tpu.matmul %256, %257, %cst_168 {dimension_numbers = #tpu.dot_dimension_numbers<[1], [0], [0], [1], [0, 0, 1, 1], [], []>} : vector<16x16xbf16>, vector<16x16xbf16>, vector<16x16xf32> -> vector<16x16xf32>
    %259 = arith.truncf %258 : vector<16x16xf32> to vector<16x16xbf16>
    %c1_169 = arith.constant 1 : index
    %c0_170 = arith.constant 0 : index
    %c0_171 = arith.constant 0 : index
    %c0_172 = arith.constant 0 : index
    %260 = vector.load %arg16[%c1_169, %c0_170, %c0_171, %c0_172] : memref<2x2x16x32xbf16, #tpu.memory_space<vmem>>, vector<1x1x16x32xbf16>
    %261 = vector.shape_cast %260 : vector<1x1x16x32xbf16> to vector<16x32xbf16>
    %cst_173 = arith.constant dense<0.000000e+00> : vector<16x32xf32>
    %262 = tpu.matmul %259, %261, %cst_173 {dimension_numbers = #tpu.dot_dimension_numbers<[1], [0], [0], [1], [0, 0, 1, 1], [], []>} : vector<16x16xbf16>, vector<16x32xbf16>, vector<16x32xf32> -> vector<16x32xf32>
    %263 = arith.addf %220, %262 : vector<16x32xf32>
    %c1_174 = arith.constant 1 : index
    %c1_175 = arith.constant 1 : index
    %c0_176 = arith.constant 0 : index
    %c0_177 = arith.constant 0 : index
    %264 = vector.load %arg10[%c1_174, %c1_175, %c0_176, %c0_177] : memref<2x2x32x16xbf16, #tpu.memory_space<vmem>>, vector<1x1x32x16xbf16>
    %265 = vector.shape_cast %264 : vector<1x1x32x16xbf16> to vector<32x16xbf16>
    %cst_178 = arith.constant dense<0.000000e+00> : vector<16x16xf32>
    %266 = tpu.matmul %219, %265, %cst_178 {dimension_numbers = #tpu.dot_dimension_numbers<[1], [0], [0], [1], [0, 0, 1, 1], [], []>} : vector<16x32xbf16>, vector<32x16xbf16>, vector<16x16xf32> -> vector<16x16xf32>
    %c1_179 = arith.constant 1 : index
    %c1_180 = arith.constant 1 : index
    %c0_181 = arith.constant 0 : index
    %c0_182 = arith.constant 0 : index
    %267 = vector.load %arg13[%c1_179, %c1_180, %c0_181, %c0_182] : memref<2x2x1x16xf32, #tpu.memory_space<vmem>>, vector<1x1x1x16xf32>
    %268 = vector.shape_cast %267 : vector<1x1x1x16xf32> to vector<1x16xf32>
    %269 = vector.broadcast %268 : vector<1x16xf32> to vector<16x16xf32>
    %270 = arith.addf %266, %269 : vector<16x16xf32>
    %c1_183 = arith.constant 1 : index
    %c1_184 = arith.constant 1 : index
    %c0_185 = arith.constant 0 : index
    %c0_186 = arith.constant 0 : index
    %271 = vector.load %arg11[%c1_183, %c1_184, %c0_185, %c0_186] : memref<2x2x32x16xbf16, #tpu.memory_space<vmem>>, vector<1x1x32x16xbf16>
    %272 = vector.shape_cast %271 : vector<1x1x32x16xbf16> to vector<32x16xbf16>
    %cst_187 = arith.constant dense<0.000000e+00> : vector<16x16xf32>
    %273 = tpu.matmul %219, %272, %cst_187 {dimension_numbers = #tpu.dot_dimension_numbers<[1], [0], [0], [1], [0, 0, 1, 1], [], []>} : vector<16x32xbf16>, vector<32x16xbf16>, vector<16x16xf32> -> vector<16x16xf32>
    %c1_188 = arith.constant 1 : index
    %c1_189 = arith.constant 1 : index
    %c0_190 = arith.constant 0 : index
    %c0_191 = arith.constant 0 : index
    %274 = vector.load %arg14[%c1_188, %c1_189, %c0_190, %c0_191] : memref<2x2x1x16xf32, #tpu.memory_space<vmem>>, vector<1x1x1x16xf32>
    %275 = vector.shape_cast %274 : vector<1x1x1x16xf32> to vector<1x16xf32>
    %276 = vector.broadcast %275 : vector<1x16xf32> to vector<16x16xf32>
    %277 = arith.addf %273, %276 : vector<16x16xf32>
    %c1_192 = arith.constant 1 : index
    %c1_193 = arith.constant 1 : index
    %c0_194 = arith.constant 0 : index
    %c0_195 = arith.constant 0 : index
    %278 = vector.load %arg12[%c1_192, %c1_193, %c0_194, %c0_195] : memref<2x2x32x16xbf16, #tpu.memory_space<vmem>>, vector<1x1x32x16xbf16>
    %279 = vector.shape_cast %278 : vector<1x1x32x16xbf16> to vector<32x16xbf16>
    %cst_196 = arith.constant dense<0.000000e+00> : vector<16x16xf32>
    %280 = tpu.matmul %219, %279, %cst_196 {dimension_numbers = #tpu.dot_dimension_numbers<[1], [0], [0], [1], [0, 0, 1, 1], [], []>} : vector<16x32xbf16>, vector<32x16xbf16>, vector<16x16xf32> -> vector<16x16xf32>
    %c1_197 = arith.constant 1 : index
    %c1_198 = arith.constant 1 : index
    %c0_199 = arith.constant 0 : index
    %c0_200 = arith.constant 0 : index
    %281 = vector.load %arg15[%c1_197, %c1_198, %c0_199, %c0_200] : memref<2x2x1x16xf32, #tpu.memory_space<vmem>>, vector<1x1x1x16xf32>
    %282 = vector.shape_cast %281 : vector<1x1x1x16xf32> to vector<1x16xf32>
    %283 = vector.broadcast %282 : vector<1x16xf32> to vector<16x16xf32>
    %284 = arith.addf %280, %283 : vector<16x16xf32>
    %285 = arith.truncf %270 : vector<16x16xf32> to vector<16x16xbf16>
    %286 = arith.truncf %277 : vector<16x16xf32> to vector<16x16xbf16>
    "tpu.trace_start"() <{level = 10 : i32, message = "md,nd->mn"}> : () -> ()
    %cst_201 = arith.constant dense<0.000000e+00> : vector<16x16xf32>
    %287 = tpu.matmul %285, %286, %cst_201 {dimension_numbers = #tpu.dot_dimension_numbers<[1], [1], [0], [0], [0, 0, 1, 0], [], []>} : vector<16x16xbf16>, vector<16x16xbf16>, vector<16x16xf32> -> vector<16x16xf32>
    "tpu.trace_stop"() : () -> ()
    %288 = arith.addf %287, %43 : vector<16x16xf32>
    %cst_202 = arith.constant dense<0xFF800000> : vector<16xf32>
    %289 = vector.multi_reduction <maximumf>, %288, %cst_202 [1] : vector<16x16xf32> to vector<16xf32>
    %290 = vector.shape_cast %289 : vector<16xf32> to vector<16x1xf32>
    %291 = vector.broadcast %290 : vector<16x1xf32> to vector<16x16xf32>
    %292 = arith.subf %288, %291 : vector<16x16xf32>
    %293 = math.exp %292 : vector<16x16xf32>
    %cst_203 = arith.constant dense<0.000000e+00> : vector<16xf32>
    %294 = vector.multi_reduction <add>, %293, %cst_203 [1] : vector<16x16xf32> to vector<16xf32>
    %295 = vector.shape_cast %294 : vector<16xf32> to vector<16x1xf32>
    %296 = tpu.reciprocal %295 {approx = true} : vector<16x1xf32> -> vector<16x1xf32>
    %297 = vector.broadcast %296 : vector<16x1xf32> to vector<16x16xf32>
    %298 = arith.mulf %293, %297 : vector<16x16xf32>
    %299 = arith.truncf %298 : vector<16x16xf32> to vector<16x16xbf16>
    %300 = arith.truncf %284 : vector<16x16xf32> to vector<16x16xbf16>
    %cst_204 = arith.constant dense<0.000000e+00> : vector<16x16xf32>
    %301 = tpu.matmul %299, %300, %cst_204 {dimension_numbers = #tpu.dot_dimension_numbers<[1], [0], [0], [1], [0, 0, 1, 1], [], []>} : vector<16x16xbf16>, vector<16x16xbf16>, vector<16x16xf32> -> vector<16x16xf32>
    %302 = arith.truncf %301 : vector<16x16xf32> to vector<16x16xbf16>
    %c1_205 = arith.constant 1 : index
    %c1_206 = arith.constant 1 : index
    %c0_207 = arith.constant 0 : index
    %c0_208 = arith.constant 0 : index
    %303 = vector.load %arg16[%c1_205, %c1_206, %c0_207, %c0_208] : memref<2x2x16x32xbf16, #tpu.memory_space<vmem>>, vector<1x1x16x32xbf16>
    %304 = vector.shape_cast %303 : vector<1x1x16x32xbf16> to vector<16x32xbf16>
    %cst_209 = arith.constant dense<0.000000e+00> : vector<16x32xf32>
    %305 = tpu.matmul %302, %304, %cst_209 {dimension_numbers = #tpu.dot_dimension_numbers<[1], [0], [0], [1], [0, 0, 1, 1], [], []>} : vector<16x16xbf16>, vector<16x32xbf16>, vector<16x32xf32> -> vector<16x32xf32>
    %306 = arith.addf %263, %305 : vector<16x32xf32>
    %c1_210 = arith.constant 1 : index
    %c0_211 = arith.constant 0 : index
    %c0_212 = arith.constant 0 : index
    %307 = vector.load %arg17[%c1_210, %c0_211, %c0_212] : memref<2x1x32xf32, #tpu.memory_space<vmem>>, vector<1x1x32xf32>
    %308 = vector.shape_cast %307 : vector<1x1x32xf32> to vector<1x32xf32>
    %309 = vector.broadcast %308 : vector<1x32xf32> to vector<16x32xf32>
    %310 = arith.addf %306, %309 : vector<16x32xf32>
    %311 = arith.addf %310, %218 : vector<16x32xf32>
    %c1_213 = arith.constant 1 : index
    %c0_214 = arith.constant 0 : index
    %c0_215 = arith.constant 0 : index
    %312 = vector.load %arg18[%c1_213, %c0_214, %c0_215] : memref<2x1x32xf32, #tpu.memory_space<vmem>>, vector<1x1x32xf32>
    %313 = vector.shape_cast %312 : vector<1x1x32xf32> to vector<1x32xf32>
    %c1_216 = arith.constant 1 : index
    %c0_217 = arith.constant 0 : index
    %c0_218 = arith.constant 0 : index
    %314 = vector.load %arg19[%c1_216, %c0_217, %c0_218] : memref<2x1x32xf32, #tpu.memory_space<vmem>>, vector<1x1x32xf32>
    %315 = vector.shape_cast %314 : vector<1x1x32xf32> to vector<1x32xf32>
    %cst_219 = arith.constant dense<0.000000e+00> : vector<16xf32>
    %316 = vector.multi_reduction <add>, %311, %cst_219 [1] : vector<16x32xf32> to vector<16xf32>
    %317 = vector.shape_cast %316 : vector<16xf32> to vector<16x1xf32>
    %cst_220 = arith.constant 3.200000e+01 : f32
    %318 = vector.broadcast %cst_220 : f32 to vector<16x1xf32>
    %319 = arith.divf %317, %318 : vector<16x1xf32>
    %320 = arith.mulf %311, %311 : vector<16x32xf32>
    %cst_221 = arith.constant dense<0.000000e+00> : vector<16xf32>
    %321 = vector.multi_reduction <add>, %320, %cst_221 [1] : vector<16x32xf32> to vector<16xf32>
    %322 = vector.shape_cast %321 : vector<16xf32> to vector<16x1xf32>
    %cst_222 = arith.constant 3.200000e+01 : f32
    %323 = vector.broadcast %cst_222 : f32 to vector<16x1xf32>
    %324 = arith.divf %322, %323 : vector<16x1xf32>
    %325 = arith.mulf %319, %319 : vector<16x1xf32>
    %326 = arith.subf %324, %325 : vector<16x1xf32>
    %327 = vector.broadcast %319 : vector<16x1xf32> to vector<16x32xf32>
    %328 = arith.subf %311, %327 : vector<16x32xf32>
    %cst_223 = arith.constant 9.99999996E-13 : f32
    %329 = vector.broadcast %cst_223 : f32 to vector<16x1xf32>
    %330 = arith.addf %326, %329 : vector<16x1xf32>
    %331 = math.rsqrt %330 : vector<16x1xf32>
    %332 = vector.broadcast %331 : vector<16x1xf32> to vector<16x32xf32>
    %333 = arith.mulf %328, %332 : vector<16x32xf32>
    %334 = vector.broadcast %313 : vector<1x32xf32> to vector<16x32xf32>
    %335 = arith.mulf %333, %334 : vector<16x32xf32>
    %336 = vector.broadcast %315 : vector<1x32xf32> to vector<16x32xf32>
    %337 = arith.addf %335, %336 : vector<16x32xf32>
    %338 = arith.truncf %337 : vector<16x32xf32> to vector<16x32xbf16>
    %c1_224 = arith.constant 1 : index
    %c0_225 = arith.constant 0 : index
    %c0_226 = arith.constant 0 : index
    %339 = vector.load %arg20[%c1_224, %c0_225, %c0_226] : memref<2x32x64xbf16, #tpu.memory_space<vmem>>, vector<1x32x64xbf16>
    %340 = vector.shape_cast %339 : vector<1x32x64xbf16> to vector<32x64xbf16>
    %cst_227 = arith.constant dense<0.000000e+00> : vector<16x64xf32>
    %341 = tpu.matmul %338, %340, %cst_227 {dimension_numbers = #tpu.dot_dimension_numbers<[1], [0], [0], [1], [0, 0, 1, 1], [], []>} : vector<16x32xbf16>, vector<32x64xbf16>, vector<16x64xf32> -> vector<16x64xf32>
    %c1_228 = arith.constant 1 : index
    %c0_229 = arith.constant 0 : index
    %c0_230 = arith.constant 0 : index
    %342 = vector.load %arg21[%c1_228, %c0_229, %c0_230] : memref<2x1x64xf32, #tpu.memory_space<vmem>>, vector<1x1x64xf32>
    %343 = vector.shape_cast %342 : vector<1x1x64xf32> to vector<1x64xf32>
    %344 = vector.broadcast %343 : vector<1x64xf32> to vector<16x64xf32>
    %345 = arith.addf %341, %344 : vector<16x64xf32>
    %346 = arith.mulf %345, %345 : vector<16x64xf32>
    %347 = arith.mulf %345, %346 : vector<16x64xf32>
    %cst_231 = arith.constant 4.471500e-02 : f32
    %348 = vector.broadcast %cst_231 : f32 to vector<16x64xf32>
    %349 = arith.mulf %348, %347 : vector<16x64xf32>
    %350 = arith.addf %345, %349 : vector<16x64xf32>
    %cst_232 = arith.constant 0.797884583 : f32
    %351 = vector.broadcast %cst_232 : f32 to vector<16x64xf32>
    %352 = arith.mulf %351, %350 : vector<16x64xf32>
    %353 = math.tanh %352 : vector<16x64xf32>
    %cst_233 = arith.constant 1.000000e+00 : f32
    %354 = vector.broadcast %cst_233 : f32 to vector<16x64xf32>
    %355 = arith.addf %354, %353 : vector<16x64xf32>
    %cst_234 = arith.constant 5.000000e-01 : f32
    %356 = vector.broadcast %cst_234 : f32 to vector<16x64xf32>
    %357 = arith.mulf %356, %355 : vector<16x64xf32>
    %358 = arith.mulf %345, %357 : vector<16x64xf32>
    %359 = arith.truncf %358 : vector<16x64xf32> to vector<16x64xbf16>
    %c1_235 = arith.constant 1 : index
    %c0_236 = arith.constant 0 : index
    %c0_237 = arith.constant 0 : index
    %360 = vector.load %arg22[%c1_235, %c0_236, %c0_237] : memref<2x64x32xbf16, #tpu.memory_space<vmem>>, vector<1x64x32xbf16>
    %361 = vector.shape_cast %360 : vector<1x64x32xbf16> to vector<64x32xbf16>
    %cst_238 = arith.constant dense<0.000000e+00> : vector<16x32xf32>
    %362 = tpu.matmul %359, %361, %cst_238 {dimension_numbers = #tpu.dot_dimension_numbers<[1], [0], [0], [1], [0, 0, 1, 1], [], []>} : vector<16x64xbf16>, vector<64x32xbf16>, vector<16x32xf32> -> vector<16x32xf32>
    %c1_239 = arith.constant 1 : index
    %c0_240 = arith.constant 0 : index
    %c0_241 = arith.constant 0 : index
    %363 = vector.load %arg23[%c1_239, %c0_240, %c0_241] : memref<2x1x32xf32, #tpu.memory_space<vmem>>, vector<1x1x32xf32>
    %364 = vector.shape_cast %363 : vector<1x1x32xf32> to vector<1x32xf32>
    %365 = vector.broadcast %364 : vector<1x32xf32> to vector<16x32xf32>
    %366 = arith.addf %362, %365 : vector<16x32xf32>
    %367 = arith.addf %366, %337 : vector<16x32xf32>
    %c1_242 = arith.constant 1 : index
    %c0_243 = arith.constant 0 : index
    %c0_244 = arith.constant 0 : index
    %368 = vector.load %arg24[%c1_242, %c0_243, %c0_244] : memref<2x1x32xf32, #tpu.memory_space<vmem>>, vector<1x1x32xf32>
    %369 = vector.shape_cast %368 : vector<1x1x32xf32> to vector<1x32xf32>
    %c1_245 = arith.constant 1 : index
    %c0_246 = arith.constant 0 : index
    %c0_247 = arith.constant 0 : index
    %370 = vector.load %arg25[%c1_245, %c0_246, %c0_247] : memref<2x1x32xf32, #tpu.memory_space<vmem>>, vector<1x1x32xf32>
    %371 = vector.shape_cast %370 : vector<1x1x32xf32> to vector<1x32xf32>
    %cst_248 = arith.constant dense<0.000000e+00> : vector<16xf32>
    %372 = vector.multi_reduction <add>, %367, %cst_248 [1] : vector<16x32xf32> to vector<16xf32>
    %373 = vector.shape_cast %372 : vector<16xf32> to vector<16x1xf32>
    %cst_249 = arith.constant 3.200000e+01 : f32
    %374 = vector.broadcast %cst_249 : f32 to vector<16x1xf32>
    %375 = arith.divf %373, %374 : vector<16x1xf32>
    %376 = arith.mulf %367, %367 : vector<16x32xf32>
    %cst_250 = arith.constant dense<0.000000e+00> : vector<16xf32>
    %377 = vector.multi_reduction <add>, %376, %cst_250 [1] : vector<16x32xf32> to vector<16xf32>
    %378 = vector.shape_cast %377 : vector<16xf32> to vector<16x1xf32>
    %cst_251 = arith.constant 3.200000e+01 : f32
    %379 = vector.broadcast %cst_251 : f32 to vector<16x1xf32>
    %380 = arith.divf %378, %379 : vector<16x1xf32>
    %381 = arith.mulf %375, %375 : vector<16x1xf32>
    %382 = arith.subf %380, %381 : vector<16x1xf32>
    %383 = vector.broadcast %375 : vector<16x1xf32> to vector<16x32xf32>
    %384 = arith.subf %367, %383 : vector<16x32xf32>
    %cst_252 = arith.constant 9.99999996E-13 : f32
    %385 = vector.broadcast %cst_252 : f32 to vector<16x1xf32>
    %386 = arith.addf %382, %385 : vector<16x1xf32>
    %387 = math.rsqrt %386 : vector<16x1xf32>
    %388 = vector.broadcast %387 : vector<16x1xf32> to vector<16x32xf32>
    %389 = arith.mulf %384, %388 : vector<16x32xf32>
    %390 = vector.broadcast %369 : vector<1x32xf32> to vector<16x32xf32>
    %391 = arith.mulf %389, %390 : vector<16x32xf32>
    %392 = vector.broadcast %371 : vector<1x32xf32> to vector<16x32xf32>
    %393 = arith.addf %391, %392 : vector<16x32xf32>
    %c0_253 = arith.constant 0 : index
    %c0_254 = arith.constant 0 : index
    %394 = vector.load %arg5[%c0_253, %c0_254] : memref<2x16xbf16, #tpu.memory_space<vmem>>, vector<2x16xbf16>
    %395 = arith.truncf %393 : vector<16x32xf32> to vector<16x32xbf16>
    %cst_255 = arith.constant dense<0.000000e+00> : vector<2x32xf32>
    %396 = tpu.matmul %394, %395, %cst_255 {dimension_numbers = #tpu.dot_dimension_numbers<[1], [0], [0], [1], [0, 0, 1, 1], [], []>} : vector<2x16xbf16>, vector<16x32xbf16>, vector<2x32xf32> -> vector<2x32xf32>
    %397 = arith.truncf %396 : vector<2x32xf32> to vector<2x32xbf16>
    %c0_256 = arith.constant 0 : index
    %c0_257 = arith.constant 0 : index
    %398 = vector.load %arg26[%c0_256, %c0_257] : memref<32x32xbf16, #tpu.memory_space<vmem>>, vector<32x32xbf16>
    %cst_258 = arith.constant dense<0.000000e+00> : vector<2x32xf32>
    %399 = tpu.matmul %397, %398, %cst_258 {dimension_numbers = #tpu.dot_dimension_numbers<[1], [0], [0], [1], [0, 0, 1, 1], [], []>} : vector<2x32xbf16>, vector<32x32xbf16>, vector<2x32xf32> -> vector<2x32xf32>
    %c0_259 = arith.constant 0 : index
    %c0_260 = arith.constant 0 : index
    %400 = vector.load %arg27[%c0_259, %c0_260] : memref<1x32xf32, #tpu.memory_space<vmem>>, vector<1x32xf32>
    %401 = vector.broadcast %400 : vector<1x32xf32> to vector<2x32xf32>
    %402 = arith.addf %399, %401 : vector<2x32xf32>
    %403 = math.tanh %402 : vector<2x32xf32>
    %c0_261 = arith.constant 0 : index
    %c0_262 = arith.constant 0 : index
    %404 = vector.load %arg28[%c0_261, %c0_262] : memref<1x32xf32, #tpu.memory_space<vmem>>, vector<1x32xf32>
    %405 = vector.broadcast %404 : vector<1x32xf32> to vector<2x32xf32>
    %406 = arith.mulf %403, %405 : vector<2x32xf32>
    %cst_263 = arith.constant dense<0.000000e+00> : vector<2xf32>
    %407 = vector.multi_reduction <add>, %406, %cst_263 [1] : vector<2x32xf32> to vector<2xf32>
    %408 = vector.shape_cast %407 : vector<2xf32> to vector<2x1xf32>
    %c0_264 = arith.constant 0 : index
    %c0_265 = arith.constant 0 : index
    %409 = vector.load %arg3[%c0_264, %c0_265] : memref<2x2xf32, #tpu.memory_space<vmem>>, vector<2x2xf32>
    %c0_266 = arith.constant 0 : index
    %c0_267 = arith.constant 0 : index
    %410 = vector.load %arg29[%c0_266, %c0_267] : memref<1x2xf32, #tpu.memory_space<vmem>>, vector<1x2xf32>
    %411 = vector.broadcast %410 : vector<1x2xf32> to vector<2x2xf32>
    %412 = arith.mulf %409, %411 : vector<2x2xf32>
    %cst_268 = arith.constant dense<0.000000e+00> : vector<2xf32>
    %413 = vector.multi_reduction <add>, %412, %cst_268 [1] : vector<2x2xf32> to vector<2xf32>
    %414 = vector.shape_cast %413 : vector<2xf32> to vector<2x1xf32>
    %415 = arith.addf %408, %414 : vector<2x1xf32>
    %c0_269 = arith.constant 0 : index
    %c0_270 = arith.constant 0 : index
    %416 = vector.load %arg30[%c0_269, %c0_270] : memref<1x1xf32, #tpu.memory_space<vmem>>, vector<1x1xf32>
    %417 = vector.broadcast %416 : vector<1x1xf32> to vector<2x1xf32>
    %418 = arith.addf %415, %417 : vector<2x1xf32>
    %c0_271 = arith.constant 0 : index
    %c0_272 = arith.constant 0 : index
    %419 = vector.load %arg31[%c0_271, %c0_272] : memref<2x1xf32, #tpu.memory_space<vmem>>, vector<2x1xf32>
    tpu.vector_store %arg31[%c0_271, %c0_272], %418 {strides = array<i32>} : memref<2x1xf32, #tpu.memory_space<vmem>>, vector<2x1xf32>,
    return
  }
  func.func @transform_0(%arg0: i32) -> (i32, i32) {
    %c0_i32 = arith.constant 0 : i32
    %c0_i32_0 = arith.constant 0 : i32
    return %arg0, %c0_i32 : i32, i32
  }
  func.func @transform_1(%arg0: i32) -> (i32, i32) {
    %c0_i32 = arith.constant 0 : i32
    %c0_i32_0 = arith.constant 0 : i32
    return %arg0, %c0_i32 : i32, i32
  }
  func.func @transform_2(%arg0: i32) -> (i32, i32) {
    %c0_i32 = arith.constant 0 : i32
    %c0_i32_0 = arith.constant 0 : i32
    return %arg0, %c0_i32 : i32, i32
  }
  func.func @transform_3(%arg0: i32) -> (i32, i32) {
    %c0_i32 = arith.constant 0 : i32
    %c0_i32_0 = arith.constant 0 : i32
    %c0_i32_1 = arith.constant 0 : i32
    return %c0_i32, %c0_i32_0 : i32, i32
  }
  func.func @transform_4(%arg0: i32) -> (i32, i32) {
    %c0_i32 = arith.constant 0 : i32
    %c0_i32_0 = arith.constant 0 : i32
    %c0_i32_1 = arith.constant 0 : i32
    return %c0_i32, %c0_i32_0 : i32, i32
  }
  func.func @transform_5(%arg0: i32) -> (i32, i32) {
    %c0_i32 = arith.constant 0 : i32
    %c0_i32_0 = arith.constant 0 : i32
    %c0_i32_1 = arith.constant 0 : i32
    return %c0_i32, %c0_i32_0 : i32, i32
  }
  func.func @transform_6(%arg0: i32) -> (i32, i32) {
    %c0_i32 = arith.constant 0 : i32
    %c0_i32_0 = arith.constant 0 : i32
    %c0_i32_1 = arith.constant 0 : i32
    return %c0_i32, %c0_i32_0 : i32, i32
  }
  func.func @transform_7(%arg0: i32) -> (i32, i32) {
    %c0_i32 = arith.constant 0 : i32
    %c0_i32_0 = arith.constant 0 : i32
    %c0_i32_1 = arith.constant 0 : i32
    return %c0_i32, %c0_i32_0 : i32, i32
  }
  func.func @transform_8(%arg0: i32) -> (i32, i32) {
    %c0_i32 = arith.constant 0 : i32
    %c0_i32_0 = arith.constant 0 : i32
    %c0_i32_1 = arith.constant 0 : i32
    return %c0_i32, %c0_i32_0 : i32, i32
  }
  func.func @transform_9(%arg0: i32) -> (i32, i32, i32, i32) {
    %c0_i32 = arith.constant 0 : i32
    %c0_i32_0 = arith.constant 0 : i32
    %c0_i32_1 = arith.constant 0 : i32
    %c0_i32_2 = arith.constant 0 : i32
    %c0_i32_3 = arith.constant 0 : i32
    return %c0_i32, %c0_i32_0, %c0_i32_1, %c0_i32_2 : i32, i32, i32, i32
  }
  func.func @transform_10(%arg0: i32) -> (i32, i32, i32, i32) {
    %c0_i32 = arith.constant 0 : i32
    %c0_i32_0 = arith.constant 0 : i32
    %c0_i32_1 = arith.constant 0 : i32
    %c0_i32_2 = arith.constant 0 : i32
    %c0_i32_3 = arith.constant 0 : i32
    return %c0_i32, %c0_i32_0, %c0_i32_1, %c0_i32_2 : i32, i32, i32, i32
  }
  func.func @transform_11(%arg0: i32) -> (i32, i32, i32, i32) {
    %c0_i32 = arith.constant 0 : i32
    %c0_i32_0 = arith.constant 0 : i32
    %c0_i32_1 = arith.constant 0 : i32
    %c0_i32_2 = arith.constant 0 : i32
    %c0_i32_3 = arith.constant 0 : i32
    return %c0_i32, %c0_i32_0, %c0_i32_1, %c0_i32_2 : i32, i32, i32, i32
  }
  func.func @transform_12(%arg0: i32) -> (i32, i32, i32, i32) {
    %c0_i32 = arith.constant 0 : i32
    %c0_i32_0 = arith.constant 0 : i32
    %c0_i32_1 = arith.constant 0 : i32
    %c0_i32_2 = arith.constant 0 : i32
    %c0_i32_3 = arith.constant 0 : i32
    return %c0_i32, %c0_i32_0, %c0_i32_1, %c0_i32_2 : i32, i32, i32, i32
  }
  func.func @transform_13(%arg0: i32) -> (i32, i32, i32, i32) {
    %c0_i32 = arith.constant 0 : i32
    %c0_i32_0 = arith.constant 0 : i32
    %c0_i32_1 = arith.constant 0 : i32
    %c0_i32_2 = arith.constant 0 : i32
    %c0_i32_3 = arith.constant 0 : i32
    return %c0_i32, %c0_i32_0, %c0_i32_1, %c0_i32_2 : i32, i32, i32, i32
  }
  func.func @transform_14(%arg0: i32) -> (i32, i32, i32, i32) {
    %c0_i32 = arith.constant 0 : i32
    %c0_i32_0 = arith.constant 0 : i32
    %c0_i32_1 = arith.constant 0 : i32
    %c0_i32_2 = arith.constant 0 : i32
    %c0_i32_3 = arith.constant 0 : i32
    return %c0_i32, %c0_i32_0, %c0_i32_1, %c0_i32_2 : i32, i32, i32, i32
  }
  func.func @transform_15(%arg0: i32) -> (i32, i32, i32, i32) {
    %c0_i32 = arith.constant 0 : i32
    %c0_i32_0 = arith.constant 0 : i32
    %c0_i32_1 = arith.constant 0 : i32
    %c0_i32_2 = arith.constant 0 : i32
    %c0_i32_3 = arith.constant 0 : i32
    return %c0_i32, %c0_i32_0, %c0_i32_1, %c0_i32_2 : i32, i32, i32, i32
  }
  func.func @transform_16(%arg0: i32) -> (i32, i32, i32) {
    %c0_i32 = arith.constant 0 : i32
    %c0_i32_0 = arith.constant 0 : i32
    %c0_i32_1 = arith.constant 0 : i32
    %c0_i32_2 = arith.constant 0 : i32
    return %c0_i32, %c0_i32_0, %c0_i32_1 : i32, i32, i32
  }
  func.func @transform_17(%arg0: i32) -> (i32, i32, i32) {
    %c0_i32 = arith.constant 0 : i32
    %c0_i32_0 = arith.constant 0 : i32
    %c0_i32_1 = arith.constant 0 : i32
    %c0_i32_2 = arith.constant 0 : i32
    return %c0_i32, %c0_i32_0, %c0_i32_1 : i32, i32, i32
  }
  func.func @transform_18(%arg0: i32) -> (i32, i32, i32) {
    %c0_i32 = arith.constant 0 : i32
    %c0_i32_0 = arith.constant 0 : i32
    %c0_i32_1 = arith.constant 0 : i32
    %c0_i32_2 = arith.constant 0 : i32
    return %c0_i32, %c0_i32_0, %c0_i32_1 : i32, i32, i32
  }
  func.func @transform_19(%arg0: i32) -> (i32, i32, i32) {
    %c0_i32 = arith.constant 0 : i32
    %c0_i32_0 = arith.constant 0 : i32
    %c0_i32_1 = arith.constant 0 : i32
    %c0_i32_2 = arith.constant 0 : i32
    return %c0_i32, %c0_i32_0, %c0_i32_1 : i32, i32, i32
  }
  func.func @transform_20(%arg0: i32) -> (i32, i32, i32) {
    %c0_i32 = arith.constant 0 : i32
    %c0_i32_0 = arith.constant 0 : i32
    %c0_i32_1 = arith.constant 0 : i32
    %c0_i32_2 = arith.constant 0 : i32
    return %c0_i32, %c0_i32_0, %c0_i32_1 : i32, i32, i32
  }
  func.func @transform_21(%arg0: i32) -> (i32, i32, i32) {
    %c0_i32 = arith.constant 0 : i32
    %c0_i32_0 = arith.constant 0 : i32
    %c0_i32_1 = arith.constant 0 : i32
    %c0_i32_2 = arith.constant 0 : i32
    return %c0_i32, %c0_i32_0, %c0_i32_1 : i32, i32, i32
  }
  func.func @transform_22(%arg0: i32) -> (i32, i32, i32) {
    %c0_i32 = arith.constant 0 : i32
    %c0_i32_0 = arith.constant 0 : i32
    %c0_i32_1 = arith.constant 0 : i32
    %c0_i32_2 = arith.constant 0 : i32
    return %c0_i32, %c0_i32_0, %c0_i32_1 : i32, i32, i32
  }
  func.func @transform_23(%arg0: i32) -> (i32, i32, i32) {
    %c0_i32 = arith.constant 0 : i32
    %c0_i32_0 = arith.constant 0 : i32
    %c0_i32_1 = arith.constant 0 : i32
    %c0_i32_2 = arith.constant 0 : i32
    return %c0_i32, %c0_i32_0, %c0_i32_1 : i32, i32, i32
  }
  func.func @transform_24(%arg0: i32) -> (i32, i32, i32) {
    %c0_i32 = arith.constant 0 : i32
    %c0_i32_0 = arith.constant 0 : i32
    %c0_i32_1 = arith.constant 0 : i32
    %c0_i32_2 = arith.constant 0 : i32
    return %c0_i32, %c0_i32_0, %c0_i32_1 : i32, i32, i32
  }
  func.func @transform_25(%arg0: i32) -> (i32, i32) {
    %c0_i32 = arith.constant 0 : i32
    %c0_i32_0 = arith.constant 0 : i32
    %c0_i32_1 = arith.constant 0 : i32
    return %c0_i32, %c0_i32_0 : i32, i32
  }
  func.func @transform_26(%arg0: i32) -> (i32, i32) {
    %c0_i32 = arith.constant 0 : i32
    %c0_i32_0 = arith.constant 0 : i32
    %c0_i32_1 = arith.constant 0 : i32
    return %c0_i32, %c0_i32_0 : i32, i32
  }
  func.func @transform_27(%arg0: i32) -> (i32, i32) {
    %c0_i32 = arith.constant 0 : i32
    %c0_i32_0 = arith.constant 0 : i32
    %c0_i32_1 = arith.constant 0 : i32
    return %c0_i32, %c0_i32_0 : i32, i32
  }
  func.func @transform_28(%arg0: i32) -> (i32, i32) {
    %c0_i32 = arith.constant 0 : i32
    %c0_i32_0 = arith.constant 0 : i32
    %c0_i32_1 = arith.constant 0 : i32
    return %c0_i32, %c0_i32_0 : i32, i32
  }
  func.func @transform_29(%arg0: i32) -> (i32, i32) {
    %c0_i32 = arith.constant 0 : i32
    %c0_i32_0 = arith.constant 0 : i32
    %c0_i32_1 = arith.constant 0 : i32
    return %c0_i32, %c0_i32_0 : i32, i32
  }
  func.func @transform_30(%arg0: i32) -> (i32, i32) {
    %c0_i32 = arith.constant 0 : i32
    %c0_i32_0 = arith.constant 0 : i32
    return %arg0, %c0_i32 : i32, i32
  }
}

</mosaic_0001>

<bundles_post_ra>
// kernel: value_regressor_forward.1
= control target key start
LH: loop header
LB: loop body
LE: loop exit
PB: predicated region body
PF: predicated region fallthrough
CT: control target
= control target key end

     0   :  { %v3207_v0 = vmov 0   ;;  %v3208_v1 = vmov 0.0   ;;  %s3209_s6 = smov 6   ;;  %vm3210_vm0 = vmmov 0   ;;  %v131_v12 = vlaneseq  ;;  %s3212_s10 = smov 5   ;;  %s3690_s0 = inlined_call_operand.smem [shape: u32[31], index: -1, kind: input, shape index: {}] }
   0x1   :  { %3094 = vset.pattern.permute.xlu0 %v3207_v0  ;;  %s1_s5 = sld [smem:[%s3690_s0]]   ;;  %2818 = vmatprep.subr.bf16.mxu0 %v3208_v1  ;;  %v3211_v16 = vmov 1.0|1.0   ;;  %vm253_vm4 = vcmask 261120   ;;  %s3213_s14 = smov 9   ;;  %vm512_vm5 = vcmask 130048   ;;  %vm1235_vm6 = vcmask 523264  }
   0x2   :  { %s2518_s9 = sld [smem:[%s3690_s0 + %s3209_s6]]   ;;  %2838 = vmatprep.subr.bf16.mxu1 %v3208_v1  ;;  %2834 = vmatprep.mubr.msk.bf16.mxu0 %vm3210_vm0, %v3208_v1  ;;  %v132_v14 = vand.u32 127, %v131_v12  ;;  %s3214_s18 = smov 10   ;;  %vm2494_vm7 = vcmask 9216   ;;  %vm2481_vm8 = vcmask 254976   ;;  %vm2507_vm9 = vcmask 1024  }
   0x3   :  { %2842 = vmatprep.mubr.msk.bf16.mxu1 %vm3210_vm0, %v3208_v1  ;;  %s2517_s13 = sld [smem:[%s3690_s0 + %s3212_s10]]   ;;  %s3215_s22 = smov 11  }
   0x4   :  { %s3279_s17 = sld [smem:[%s3690_s0 + %s3213_s14]]   ;;  %s3216_s26 = smov 7  }
   0x5   :  { %s3285_s21 = sld [smem:[%s3690_s0 + %s3214_s18]]   ;;  %s3217_s30 = smov 8  }
   0x6   :  { %s3293_s25 = sld [smem:[%s3690_s0 + %s3215_s22]]   ;;  %s3218_s4 = smov 12  }
   0x7   :  { %v129_v2 = vld [vmem:[%s1_s5] sm:$0xff]  ;;  %v130_v4 = vld [vmem:[%s1_s5 + $0x8] sm:$0xff]  ;;  %s2519_s29 = sld [smem:[%s3690_s0 + %s3216_s26]]   ;;  %s3219_s8 = smov 13  }
   0x8   :  { %134 = vperm.xlu0 %3094, %v129_v2   ;;  %v3095_v3 = vld [vmem:[%s2518_s9] sm:$0xff]   ;;  %v3096_v5 = vld [vmem:[%s2518_s9 + $0x8] sm:$0xff]   ;;  %v3097_v6 = vld [vmem:[%s2518_s9 + $0x10] sm:$0xff]   ;;  %s2520_s3 = sld [smem:[%s3690_s0 + %s3217_s30]]   ;;  %s3220_s12 = smov 14  }
   0x9   :  { %2819 = vmatpush3.bf16.msra.mxu0 %v3095_v3  ;;  %v3098_v7 = vld [vmem:[%s2518_s9 + $0x18] sm:$0xff]   ;;  %v3099_v8 = vld [vmem:[%s2518_s9 + $0x20] sm:$0xff]   ;;  %v3100_v9 = vld [vmem:[%s2518_s9 + $0x28] sm:$0xff]   ;;  %s3332_s7 = sld [smem:[%s3690_s0 + %s3218_s4]]   ;;  %s3221_s16 = smov 1  }
   0xa   :  { %2820 = vmatprep.subr.bf16.mxu0 %v3208_v1  ;;  %v3101_v10 = vld [vmem:[%s2518_s9 + $0x30] sm:$0xff]   ;;  %v3102_v11 = vld [vmem:[%s2518_s9 + $0x38] sm:$0xff]   ;;  %v160_v17 = vld [vmem:[%s2517_s13] sm:$0xff]  ;;  %s3338_s11 = sld [smem:[%s3690_s0 + %s3219_s8]]   ;;  %s3222_s22 = smov 3  }
   0xb   :  { %v161_v19 = vld [vmem:[%s2517_s13 + $0x8] sm:$0xff]  ;;  %v3103_v31 = vld [vmem:[%s3279_s17] sm:$0xff]   ;;  %s3344_s15 = sld [smem:[%s3690_s0 + %s3220_s12]]   ;;  %s3223_s27 = smov 15  }
   0xc   :  { %137 = vperm.xlu0 %3094, %v130_v4   ;;  %2839 = vmatpush3.bf16.msra.mxu1 %v3103_v31  ;;  %v3104_v32 = vld [vmem:[%s3279_s17 + $0x8] sm:$0xff]   ;;  %v3105_v59 = vld [vmem:[%s3285_s21] sm:$0xff]   ;;  %s2513_s20 = sld [smem:[%s3690_s0 + %s3221_s16]]   ;;  %s3224_s1 = smov 16  }
   0xd   :  { %2821 = vmatpush3.bf16.msra.mxu0 %v3096_v5  ;;  %2840 = vmatprep.subr.bf16.mxu1 %v3208_v1  ;;  %v2553_v50 = vld [vmem:[%s2519_s29] ss:$0 sm:$0xff]  ;;  %v3106_v61 = vld [vmem:[%s3285_s21 + $0x8] sm:$0xff]   ;;  %s2515_s26 = sld [smem:[%s3690_s0 + %s3222_s22]]   ;;  %s3225_s5 = smov 19  }
   0xe   :  { %2822 = vmatprep.subr.bf16.mxu0 %v3208_v1  ;;  %v2554_v55 = vld [vmem:[%s2520_s3] ss:$0 sm:$0xff]  ;;  %v3108_v63 = vld [vmem:[%s3293_s25 + $0x8] sm:$0xff]   ;;  %s3421_s30 = sld [smem:[%s3690_s0 + %s3223_s27]]   ;;  %s3226_s10 = smov 17  }
   0xf   :  { %v3107_v62 = vld [vmem:[%s3293_s25] sm:$0xff]   ;;  %s3439_s4 = sld [smem:[%s3690_s0 + %s3224_s1]]   ;;  %s3227_s16 = smov 18  }
  0x10   :  { %2841 = vmatpush3.bf16.msra.mxu1 %v3104_v32  ;;  %v2556_v0 = vld [vmem:[%s3332_s7] ss:$0 sm:$0xff]  ;;  %s3451_s9 = sld [smem:[%s3690_s0 + %s3225_s5]]   ;;  %s3228_s22 = smov 21  }
  0x11   :  { %2823 = vmatpush3.bf16.msra.mxu0 %v3097_v6  ;;  %2846 = vmatprep.subr.bf16.mxu1 %v3208_v1  ;;  %s3460_s14 = sld [smem:[%s3690_s0 + %s3226_s10]]   ;;  %s3229_s27 = smov 20  }
  0x12   :  { %2824 = vmatprep.subr.bf16.mxu0 %v3208_v1  ;;  %v303_v31 = vld [vmem:[%s2513_s20] sm:$0x1]  ;;  %s3465_s20 = sld [smem:[%s3690_s0 + %s3227_s16]]   ;;  %s3230_s2 = smov 22  }
  0x13   :  { %v2555_v32 = vadd.f32 -1.0, %v303_v31  ;;  %s3488_s1 = sld [smem:[%s3690_s0 + %s3229_s27]]   ;;  %s3231_s8 = smov 23  }
  0x14   :  { %s3497_s6 = sld [smem:[%s3690_s0 + %s3230_s2]]   ;;  %s3232_s16 = smov 24  }
  0x15   :  { %2825 = vmatpush3.bf16.msra.mxu0 %v3098_v7  ;;  %s3515_s13 = sld [smem:[%s3690_s0 + %s3231_s8]]   ;;  %s3236_s24 = smov 28  }
  0x16   :  { %2826 = vmatprep.subr.bf16.mxu0 %v3208_v1  ;;  %s2540_s28 = sld [smem:[%s3690_s0 + %s3236_s24]]   ;;  %s3237_s29 = smov 26  }
  0x17   :  { %s2538_s3 = sld [smem:[%s3690_s0 + %s3237_s29]]   ;;  %s3238_s5 = smov 27  }
  0x18   :  { %s2539_s10 = sld [smem:[%s3690_s0 + %s3238_s5]]   ;;  %s3239_s12 = smov 29  }
  0x19   :  { %2827 = vmatpush3.bf16.msra.mxu0 %v3099_v8  ;;  %s2541_s18 = sld [smem:[%s3690_s0 + %s3239_s12]]   ;;  %s3240_s19 = smov 30  }
  0x1a   :  { %2828 = vmatprep.subr.bf16.mxu0 %v3208_v1 }
  0x1d   :  { %2829 = vmatpush3.bf16.msra.mxu0 %v3100_v9  ;;  %v2560_v9 = vld [vmem:[%s3338_s11] ss:$0 sm:$0xff] }
  0x1e   :  { %2830 = vmatprep.subr.bf16.mxu0 %v3208_v1 }
  0x21   :  { %2831 = vmatpush3.bf16.msra.mxu0 %v3101_v10 }
  0x22   :  { %2832 = vmatprep.subr.bf16.mxu0 %v3208_v1 }
  0x25   :  { %2833 = vmatpush3.bf16.msra.mxu0 %v3102_v11 }
  0x26   :  { %2868 = vmatprep.subr.bf16.mxu0 %v3208_v1 }
  0x87   :  { %v135_v13 = vpop.permute.xlu0 %134 }
  0x88   :  { %vm139_vm1 = vcmp.eq.s32.totalorder %v132_v14, %v135_v13 }
  0x8b   :  { %v138_v15 = vpop.permute.xlu0 %137 }
  0x8c   :  { %vm140_vm2 = vcmp.eq.s32.totalorder %v132_v14, %v138_v15 }
  0x8d   :  { %vm2551_vm3 = vmpackc.low %vm140_vm2, %vm139_vm1 }
  0x8e   :  { %2835 = vmatmul.mubr.msk.bf16.vlgmr.msra.gmra.mrb[0].mxu0 %vm2551_vm3, %v3211_v16 }
  0x8f   :  { %2870 = vmatprep.mubr.msk.bf16.mxu0 %vm3210_vm0, %v3208_v1 }
 0x161   :  { %v244_v18 = vpop.f32.mrb[0].mxu0 }
 0x162   :  { %v245_v20 = vadd.f32 %v244_v18, %v160_v17  ;;  %v2836_v21 = vpop.f32.mrb[1].mxu0 }
 0x163   :  { %v247_v22 = vpop.f32.mrb[2].mxu0 }
 0x164   :  { %v248_v23 = vadd.f32 %v247_v22, %v161_v19  ;;  %v2837_v24 = vpop.f32.mrb[3].mxu0  ;;  %v254_v25 = vsel %vm253_vm4, %v245_v20, 0.0  ;;  %v263_v26 = vmul.f32 %v245_v20, %v245_v20  ;;  %v2564_v19 = vld [vmem:[%s3344_s15] ss:$0 sm:$0xff] }
 0x165   :  { %255 = vadd.xlane.f32.xlu1 %v254_v25 }
 0x166   :  { %v265_v27 = vsel %vm253_vm4, %v263_v26, 0.0  ;;  %v257_v28 = vsel %vm253_vm4, %v248_v23, 0.0  ;;  %v264_v29 = vmul.f32 %v248_v23, %v248_v23  ;;  %v3109_v26 = vld [vmem:[%s3279_s17 + $0x10] sm:$0xff]  }
 0x167   :  { %266 = vadd.xlane.f32.xlu0 %v265_v27 }
 0x168   :  { %v268_v30 = vsel %vm253_vm4, %v264_v29, 0.0  ;;  %v3111_v29 = vld [vmem:[%s3293_s25 + $0x10] sm:$0xff]  }
 0x169   :  { %258 = vadd.xlane.f32.xlu1 %v257_v28  ;;  %v3110_v28 = vld [vmem:[%s3279_s17 + $0x18] sm:$0xff]  }
 0x16d   :  { %269 = vadd.xlane.f32.xlu1 %v268_v30  ;;  %v3112_v30 = vld [vmem:[%s3293_s25 + $0x18] sm:$0xff]  }
 0x1f2   :  { %v256_v33 = vpop.xlane.xlu1 %255 }
 0x1f3   :  { %v261_v34 = vmul.f32 0.03125, %v256_v33  ;;  %v308_v33 = vshrl.u32 %v131_v12, 7 }
 0x1f4   :  { %v267_v35 = vpop.xlane.xlu0 %266 }
 0x1f5   :  { %v273_v36 = vmul.f32 %v261_v34, %v261_v34  ;;  %v271_v37 = vmul.f32 0.03125, %v267_v35  ;;  %v277_v48 = vsub.f32 %v245_v20, %v261_v34  ;;  %v305_v34 = vmul.f32 1e+09, %v2555_v32 }
 0x1f6   :  { %v259_v38 = vpop.xlane.xlu1 %258  ;;  %v309_v35 = vsub.s32 0, %v308_v33 }
 0x1f7   :  { %v275_v39 = vsub.f32 %v271_v37, %v273_v36  ;;  %v262_v40 = vmul.f32 0.03125, %v259_v38  ;;  %v301_v37 = vld [vmem:[%s2515_s26] sm:$0xff]  ;;  %v302_v38 = vld [vmem:[%s2515_s26 + $0x8] sm:$0xff]  ;;  %s3475_s26 = sld [smem:[%s3690_s0 + %s3228_s22]]  }
 0x1f8   :  { %v310_v36 = vrot.slane %v305_v34, %v309_v35  ;;  %s3520_s22 = sld [smem:[%s3690_s0 + %s3232_s16]]  }
 0x1f9   :  { %v279_v41 = vadd.f32 1e-12, %v275_v39  ;;  %v274_v43 = vmul.f32 %v262_v40, %v262_v40  ;;  %v278_v51 = vsub.f32 %v248_v23, %v262_v40 }
 0x1fa   :  { %v270_v42 = vpop.xlane.xlu1 %269  ;;  %v3376_v39 = vadd.f32 %v310_v36, %v301_v37  ;;  %v3378_v40 = vadd.f32 %v310_v36, %v302_v38 }
 0x1fb   :  { %3145 = vrsqrt.f32 %v279_v41  ;;  %v272_v44 = vmul.f32 0.03125, %v270_v42 }
 0x1fd   :  { %v276_v45 = vsub.f32 %v272_v44, %v274_v43 }
 0x1ff   :  { %v280_v46 = vadd.f32 1e-12, %v276_v45 }
 0x201   :  { %3147 = vrsqrt.f32 %v280_v46 }
 0x205   :  { %v3146_v47 = vpop.eup %3145 }
 0x206   :  { %v283_v49 = vmul.f32 %v3146_v47, %v277_v48  ;;  %v2575_v48 = vld [vmem:[%s3332_s7 + $0x1] ss:$0 sm:$0xff] }
 0x208   :  { %v291_v53 = vmul.f32 %v2553_v50, %v283_v49 }
 0x20a   :  { %v3301_v57 = vadd.f32 %v2554_v55, %v291_v53 }
 0x20b   :  { %v3148_v52 = vpop.eup %3147 }
 0x20c   :  { %v284_v54 = vmul.f32 %v3148_v52, %v278_v51 }
 0x20e   :  { %v292_v56 = vmul.f32 %v2553_v50, %v284_v54 }
 0x210   :  { %v3303_v58 = vadd.f32 %v2554_v55, %v292_v56  ;;  %v2593_v56 = vld [vmem:[%s3344_s15 + $0x1] ss:$0 sm:$0xff] }
 0x212   :  { %v3308_v60 = vpack.c.bf16 %v3303_v58, %v3301_v57 }
 0x214   :  { %2843 = vmatmul.mubr.msk.bf16.vlgmr.msra.gmra.mrb[0].mxu1 %vm253_vm4, %v3308_v60 }
 0x215   :  { %2847 = vmatpush3.bf16.msra.mxu1 %v3105_v59  ;;  %2850 = vmatprep.mubr.msk.bf16.mxu1 %vm3210_vm0, %v3208_v1 }
 0x216   :  { %2848 = vmatprep.subr.bf16.mxu1 %v3208_v1 }
 0x219   :  { %2849 = vmatpush3.bf16.msra.mxu1 %v3106_v61 }
 0x21a   :  { %2854 = vmatprep.subr.bf16.mxu1 %v3208_v1 }
 0x21c   :  { %2851 = vmatmul.mubr.msk.bf16.vlgmr.msra.gmra.mrb[4].mxu1 %vm253_vm4, %v3308_v60 }
 0x21d   :  { %2855 = vmatpush3.bf16.msra.mxu1 %v3107_v62  ;;  %2858 = vmatprep.mubr.msk.bf16.mxu1 %vm3210_vm0, %v3208_v1 }
 0x21e   :  { %2856 = vmatprep.subr.bf16.mxu1 %v3208_v1 }
 0x221   :  { %2857 = vmatpush3.bf16.msra.mxu1 %v3108_v63 }
 0x222   :  { %2862 = vmatprep.subr.bf16.mxu1 %v3208_v1 }
 0x224   :  { %2859 = vmatmul.mubr.msk.bf16.vlgmr.msra.gmra.mrb[8].mxu1 %vm253_vm4, %v3308_v60 }
 0x225   :  { %2864 = vmatprep.mubr.msk.bf16.mxu1 %vm3210_vm0, %v3208_v1 }
 0x2e7   :  { %v375_v2 = vpop.f32.mrb[0].mxu1 }
 0x2e8   :  { %v2844_v3 = vpop.f32.mrb[1].mxu1  ;;  %v376_v5 = vadd.f32 %v2556_v0, %v375_v2 }
 0x2e9   :  { %v378_v4 = vpop.f32.mrb[2].mxu1 }
 0x2ea   :  { %v379_v6 = vadd.f32 %v2556_v0, %v378_v4  ;;  %v2845_v7 = vpop.f32.mrb[3].mxu1 }
 0x2ec   :  { %v510_v8 = vpack.c.bf16 %v379_v6, %v376_v5 }
 0x2ef   :  { %v439_v10 = vpop.f32.mrb[4].mxu1 }
 0x2f0   :  { %v2852_v11 = vpop.f32.mrb[5].mxu1  ;;  %v440_v14 = vadd.f32 %v2560_v9, %v439_v10 }
 0x2f1   :  { %v442_v13 = vpop.f32.mrb[6].mxu1 }
 0x2f2   :  { %v443_v15 = vadd.f32 %v2560_v9, %v442_v13  ;;  %v2853_v16 = vpop.f32.mrb[7].mxu1 }
 0x2f4   :  { %v511_v17 = vpack.c.bf16 %v443_v15, %v440_v14 }
 0x2f6   :  { %v517_v18 = vsel %vm512_vm5, %v511_v17, 0 }
 0x2f7   :  { %v503_v20 = vpop.f32.mrb[8].mxu1  ;;  %2863 = vmatpush3.bf16.xpose.msra.mxu1 %v517_v18 }
 0x2f8   :  { %v2860_v21 = vpop.f32.mrb[9].mxu1  ;;  %2874 = vmatprep.subr.bf16.mxu1 %v3208_v1  ;;  %v504_v23 = vadd.f32 %v2564_v19, %v503_v20 }
 0x2f9   :  { %v506_v22 = vpop.f32.mrb[10].mxu1  ;;  %v3113_v21 = vld [vmem:[%s3285_s21 + $0x10] sm:$0xff]  }
 0x2fa   :  { %v507_v24 = vadd.f32 %v2564_v19, %v506_v22  ;;  %v2861_v25 = vpop.f32.mrb[11].mxu1 }
 0x2fc   :  { %v583_v27 = vpack.c.bf16 %v507_v24, %v504_v23  ;;  %v3114_v23 = vld [vmem:[%s3285_s21 + $0x18] sm:$0xff]  }
 0x2fe   :  { %2865 = vmatmul.mubr.msk.bf16.vlgmr.msra.gmra.mrb[12].mxu1 %vm512_vm5, %v510_v8  ;;  %2869 = vmatpush3.bf16.msra.mxu0 %v583_v27 }
 0x2ff   :  { %2875 = vmatpush3.bf16.msra.mxu1 %v3109_v26  ;;  %2878 = vmatprep.mubr.msk.bf16.mxu1 %vm3210_vm0, %v3208_v1 }
 0x300   :  { %2876 = vmatprep.subr.bf16.mxu1 %v3208_v1  ;;  %2882 = vmatprep.subr.bf16.mxu0 %v3208_v1 }
 0x303   :  { %2877 = vmatpush3.bf16.msra.mxu1 %v3110_v28 }
 0x304   :  { %2890 = vmatprep.subr.bf16.mxu1 %v3208_v1 }
 0x306   :  { %2879 = vmatmul.mubr.msk.bf16.vlgmr.msra.gmra.mrb[16].mxu1 %vm253_vm4, %v3308_v60 }
 0x307   :  { %2891 = vmatpush3.bf16.msra.mxu1 %v3111_v29  ;;  %2894 = vmatprep.mubr.msk.bf16.mxu1 %vm3210_vm0, %v3208_v1  ;;  %v2584_v29 = vld [vmem:[%s3338_s11 + $0x1] ss:$0 sm:$0xff] }
 0x308   :  { %2892 = vmatprep.subr.bf16.mxu1 %v3208_v1 }
 0x30b   :  { %2893 = vmatpush3.bf16.msra.mxu1 %v3112_v30 }
 0x30c   :  { %2904 = vmatprep.subr.bf16.mxu1 %v3208_v1 }
 0x30e   :  { %2895 = vmatmul.mubr.msk.bf16.vlgmr.msra.gmra.mrb[20].mxu1 %vm253_vm4, %v3308_v60 }
 0x30f   :  { %2906 = vmatprep.mubr.msk.bf16.mxu1 %vm3210_vm0, %v3208_v1 }
 0x3d1   :  { %v553_v41 = vpop.f32.mrb[12].mxu1 }
 0x3d2   :  { %v554_v42 = vadd.f32 %v553_v41, %v3376_v39  ;;  %v2866_v43 = vpop.f32.mrb[13].mxu1 }
 0x3d3   :  { %v556_v12 = vpop.f32.mrb[14].mxu1 }
 0x3d4   :  { %v557_v44 = vadd.f32 %v556_v12, %v3378_v40  ;;  %v2867_v45 = vpop.f32.mrb[15].mxu1  ;;  %v560_v46 = vsel %vm512_vm5, %v554_v42, -inf }
 0x3d5   :  { %561 = vmax.xlane.f32.xlu1 %v560_v46 }
 0x3d6   :  { %v563_v47 = vsel %vm512_vm5, %v557_v44, -inf }
 0x3d9   :  { %564 = vmax.xlane.f32.xlu1 %v563_v47  ;;  %v690_v49 = vpop.f32.mrb[16].mxu1 }
 0x3da   :  { %v2880_v50 = vpop.f32.mrb[17].mxu1  ;;  %v3385_v52 = vadd.f32 %v2575_v48, %v690_v49 }
 0x3db   :  { %v693_v51 = vpop.f32.mrb[18].mxu1 }
 0x3dc   :  { %v3387_v53 = vadd.f32 %v2575_v48, %v693_v51  ;;  %v2881_v54 = vpop.f32.mrb[19].mxu1 }
 0x3de   :  { %v829_v55 = vpack.c.bf16 %v3387_v53, %v3385_v52 }
 0x3e1   :  { %v822_v59 = vpop.f32.mrb[20].mxu1 }
 0x3e2   :  { %v2896_v61 = vpop.f32.mrb[21].mxu1  ;;  %v823_v63 = vadd.f32 %v2593_v56, %v822_v59 }
 0x3e3   :  { %v825_v62 = vpop.f32.mrb[22].mxu1 }
 0x3e4   :  { %v826_v0 = vadd.f32 %v2593_v56, %v825_v62  ;;  %v2897_v2 = vpop.f32.mrb[23].mxu1 }
 0x3e5   :  { %v3115_v2 = vld [vmem:[%s3421_s30] sm:$0xff]  }
 0x3e6   :  { %v901_v3 = vpack.c.bf16 %v826_v0, %v823_v63 }
 0x3e8   :  { %2905 = vmatpush3.bf16.msra.mxu1 %v901_v3 }
 0x3e9   :  { %2916 = vmatprep.subr.bf16.mxu1 %v3208_v1 }
 0x462   :  { %v562_v4 = vpop.xlane.xlu1 %561 }
 0x463   :  { %v566_v5 = vsub.f32 %v554_v42, %v562_v4  ;;  %v3116_v4 = vld [vmem:[%s3421_s30 + $0x8] sm:$0xff]  }
 0x465   :  { %v568_v6 = vmul.f32 1.442695, %v566_v5 }
 0x466   :  { %v565_v7 = vpop.xlane.xlu1 %564 }
 0x467   :  { %3149 = vpow2.f32 %v568_v6  ;;  %v567_v8 = vsub.f32 %v557_v44, %v565_v7 }
 0x469   :  { %v570_v9 = vmul.f32 1.442695, %v567_v8 }
 0x46b   :  { %3151 = vpow2.f32 %v570_v9 }
 0x471   :  { %v3150_v10 = vpop.eup %3149 }
 0x472   :  { %v572_v11 = vsel %vm512_vm5, %v3150_v10, 0.0 }
 0x473   :  { %573 = vadd.xlane.f32.xlu1 %v572_v11 }
 0x475   :  { %v3152_v13 = vpop.eup %3151 }
 0x476   :  { %v575_v14 = vsel %vm512_vm5, %v3152_v13, 0.0 }
 0x477   :  { %576 = vadd.xlane.f32.xlu1 %v575_v14 }
 0x500   :  { %v574_v15 = vpop.xlane.xlu1 %573 }
 0x501   :  { %3153 = vrcp.f32 %v574_v15 }
 0x504   :  { %v577_v16 = vpop.xlane.xlu1 %576 }
 0x505   :  { %3155 = vrcp.f32 %v577_v16  ;;  %v2605_v16 = vld [vmem:[%s3439_s4] ss:$0 sm:$0xff] }
 0x50b   :  { %v3154_v17 = vpop.eup %3153 }
 0x50c   :  { %v580_v19 = vmul.f32 %v3154_v17, %v3150_v10 }
 0x50f   :  { %v3156_v18 = vpop.eup %3155 }
 0x510   :  { %v581_v20 = vmul.f32 %v3156_v18, %v3152_v13 }
 0x512   :  { %v582_v22 = vpack.c.bf16 %v581_v20, %v580_v19 }
 0x514   :  { %2871 = vmatmul.mubr.msk.bf16.vlgmr.msra.gmra.mrb[4].mxu0 %vm512_vm5, %v582_v22 }
 0x515   :  { %2883 = vmatpush3.bf16.msra.mxu0 %v3113_v21  ;;  %2886 = vmatprep.mubr.msk.bf16.mxu0 %vm3210_vm0, %v3208_v1 }
 0x516   :  { %2884 = vmatprep.subr.bf16.mxu0 %v3208_v1 }
 0x519   :  { %2885 = vmatpush3.bf16.msra.mxu0 %v3114_v23 }
 0x51a   :  { %2898 = vmatprep.subr.bf16.mxu0 %v3208_v1 }
 0x51c   :  { %2887 = vmatmul.mubr.msk.bf16.vlgmr.msra.gmra.mrb[8].mxu0 %vm253_vm4, %v3308_v60 }
 0x51d   :  { %2900 = vmatprep.mubr.msk.bf16.mxu0 %vm3210_vm0, %v3208_v1 }
 0x5e7   :  { %v621_v24 = vpop.f32.mrb[4].mxu0 }
 0x5e8   :  { %v2872_v25 = vpop.f32.mrb[5].mxu0 }
 0x5e9   :  { %v624_v26 = vpop.f32.mrb[6].mxu0 }
 0x5ea   :  { %v628_v27 = vpack.c.bf16 %v624_v26, %v621_v24  ;;  %v2873_v28 = vpop.f32.mrb[7].mxu0 }
 0x5ef   :  { %v756_v30 = vpop.f32.mrb[8].mxu0 }
 0x5f0   :  { %v2888_v31 = vpop.f32.mrb[9].mxu0  ;;  %v757_v33 = vadd.f32 %v2584_v29, %v756_v30 }
 0x5f1   :  { %v759_v32 = vpop.f32.mrb[10].mxu0 }
 0x5f2   :  { %v760_v34 = vadd.f32 %v2584_v29, %v759_v32  ;;  %v2889_v35 = vpop.f32.mrb[11].mxu0 }
 0x5f4   :  { %v830_v36 = vpack.c.bf16 %v760_v34, %v757_v33 }
 0x5f6   :  { %v835_v37 = vsel %vm512_vm5, %v830_v36, 0 }
 0x5f7   :  { %2899 = vmatpush3.bf16.xpose.msra.mxu0 %v835_v37 }
 0x5f8   :  { %2910 = vmatprep.subr.bf16.mxu0 %v3208_v1 }
 0x5fe   :  { %2901 = vmatmul.mubr.msk.bf16.vlgmr.msra.gmra.mrb[12].mxu0 %vm512_vm5, %v829_v55 }
 0x5ff   :  { %2912 = vmatprep.mubr.msk.bf16.mxu0 %vm3210_vm0, %v3208_v1  ;;  %2911 = vmatpush3.bf16.msra.mxu0 %v3116_v4 }
 0x600   :  { %2922 = vmatprep.subr.bf16.mxu0 %v3208_v1 }
 0x6d1   :  { %v871_v60 = vpop.f32.mrb[12].mxu0 }
 0x6d2   :  { %v872_v38 = vadd.f32 %v871_v60, %v3376_v39  ;;  %v2902_v41 = vpop.f32.mrb[13].mxu0 }
 0x6d3   :  { %v874_v42 = vpop.f32.mrb[14].mxu0 }
 0x6d4   :  { %v875_v43 = vadd.f32 %v874_v42, %v3378_v40  ;;  %v2903_v12 = vpop.f32.mrb[15].mxu0  ;;  %v878_v44 = vsel %vm512_vm5, %v872_v38, -inf }
 0x6d5   :  { %879 = vmax.xlane.f32.xlu1 %v878_v44 }
 0x6d6   :  { %v881_v45 = vsel %vm512_vm5, %v875_v43, -inf }
 0x6d9   :  { %882 = vmax.xlane.f32.xlu1 %v881_v45 }
 0x762   :  { %v880_v46 = vpop.xlane.xlu1 %879 }
 0x763   :  { %v884_v47 = vsub.f32 %v872_v38, %v880_v46 }
 0x765   :  { %v886_v48 = vmul.f32 1.442695, %v884_v47 }
 0x766   :  { %v883_v49 = vpop.xlane.xlu1 %882 }
 0x767   :  { %3157 = vpow2.f32 %v886_v48  ;;  %v885_v50 = vsub.f32 %v875_v43, %v883_v49  ;;  %v2606_v48 = vld [vmem:[%s3460_s14] ss:$0 sm:$0xff] }
 0x769   :  { %v888_v51 = vmul.f32 1.442695, %v885_v50 }
 0x76b   :  { %3159 = vpow2.f32 %v888_v51 }
 0x771   :  { %v3158_v52 = vpop.eup %3157 }
 0x772   :  { %v890_v53 = vsel %vm512_vm5, %v3158_v52, 0.0 }
 0x773   :  { %891 = vadd.xlane.f32.xlu1 %v890_v53 }
 0x775   :  { %v3160_v54 = vpop.eup %3159 }
 0x776   :  { %v893_v55 = vsel %vm512_vm5, %v3160_v54, 0.0 }
 0x777   :  { %894 = vadd.xlane.f32.xlu0 %v893_v55 }
 0x800   :  { %v892_v56 = vpop.xlane.xlu1 %891 }
 0x801   :  { %3161 = vrcp.f32 %v892_v56 }
 0x804   :  { %v895_v59 = vpop.xlane.xlu0 %894 }
 0x805   :  { %3163 = vrcp.f32 %v895_v59 }
 0x80b   :  { %v3162_v61 = vpop.eup %3161 }
 0x80c   :  { %v898_v63 = vmul.f32 %v3162_v61, %v3158_v52 }
 0x80f   :  { %v3164_v62 = vpop.eup %3163 }
 0x810   :  { %v899_v0 = vmul.f32 %v3164_v62, %v3160_v54  ;;  %v2607_v54 = vld [vmem:[%s3465_s20] ss:$0 sm:$0xff] }
 0x811   :  { %v3119_v62 = vld [vmem:[%s3475_s26] sm:$0xff]  }
 0x812   :  { %v900_v3 = vpack.c.bf16 %v899_v0, %v898_v63  ;;  %v3120_v63 = vld [vmem:[%s3475_s26 + $0x8] sm:$0xff]   ;;  %v3121_v0 = vld [vmem:[%s3475_s26 + $0x10] sm:$0xff]  }
 0x814   :  { %2907 = vmatmul.mubr.msk.bf16.vlgmr.msra.gmra.mrb[24].mxu1 %vm512_vm5, %v900_v3  ;;  %v2608_v3 = vld [vmem:[%s3488_s1] ss:$0 sm:$0xff] }
 0x815   :  { %2917 = vmatpush3.bf16.msra.mxu1 %v3115_v2  ;;  %2918 = vmatprep.mubr.msk.bf16.mxu1 %vm3210_vm0, %v3208_v1  ;;  %v3122_v2 = vld [vmem:[%s3475_s26 + $0x18] sm:$0xff]  }
 0x816   :  { %2930 = vmatprep.subr.bf16.mxu1 %v3208_v1 }
 0x81c   :  { %2919 = vmatmul.mubr.msk.bf16.vlgmr.msra.gmra.mrb[28].mxu1 %vm512_vm5, %v628_v27 }
 0x81d   :  { %2938 = vmatprep.mubr.msk.bf16.mxu1 %vm3210_vm0, %v3208_v1  ;;  %2931 = vmatpush3.bf16.msra.mxu1 %v3119_v62 }
 0x81e   :  { %2932 = vmatprep.subr.bf16.mxu1 %v3208_v1 }
 0x821   :  { %2933 = vmatpush3.bf16.msra.mxu1 %v3120_v63 }
 0x822   :  { %2934 = vmatprep.subr.bf16.mxu1 %v3208_v1 }
 0x825   :  { %2935 = vmatpush3.bf16.msra.mxu1 %v3121_v0 }
 0x826   :  { %2936 = vmatprep.subr.bf16.mxu1 %v3208_v1 }
 0x829   :  { %2937 = vmatpush3.bf16.msra.mxu1 %v3122_v2 }
 0x82a   :  { %2958 = vmatprep.subr.bf16.mxu1 %v3208_v1 }
 0x8e7   :  { %v939_v5 = vpop.f32.mrb[24].mxu1 }
 0x8e8   :  { %v2908_v6 = vpop.f32.mrb[25].mxu1 }
 0x8e9   :  { %v942_v7 = vpop.f32.mrb[26].mxu1 }
 0x8ea   :  { %v946_v8 = vpack.c.bf16 %v942_v7, %v939_v5  ;;  %v2909_v9 = vpop.f32.mrb[27].mxu1 }
 0x8ec   :  { %2913 = vmatmul.mubr.msk.bf16.vlgmr.msra.gmra.mrb[16].mxu0 %vm512_vm5, %v946_v8 }
 0x8ed   :  { %2926 = vmatprep.mubr.msk.bf16.mxu0 %vm3210_vm0, %v3208_v1 }
 0x8ef   :  { %v1043_v10 = vpop.f32.mrb[28].mxu1 }
 0x8f0   :  { %v2920_v11 = vpop.f32.mrb[29].mxu1 }
 0x8f1   :  { %v1046_v13 = vpop.f32.mrb[30].mxu1 }
 0x8f2   :  { %v2921_v14 = vpop.f32.mrb[31].mxu1 }
 0x9bf   :  { %v993_v15 = vpop.f32.mrb[16].mxu0 }
 0x9c0   :  { %v1044_v17 = vadd.f32 %v1043_v10, %v993_v15  ;;  %v2914_v18 = vpop.f32.mrb[17].mxu0 }
 0x9c1   :  { %v996_v19 = vpop.f32.mrb[18].mxu0 }
 0x9c2   :  { %v1057_v20 = vadd.f32 %v2605_v16, %v1044_v17  ;;  %v1047_v21 = vadd.f32 %v1046_v13, %v996_v19  ;;  %v2915_v22 = vpop.f32.mrb[19].mxu0 }
 0x9c4   :  { %v1059_v23 = vadd.f32 %v1057_v20, %v3301_v57  ;;  %v1058_v24 = vadd.f32 %v2605_v16, %v1047_v21  ;;  %v3117_v57 = vld [vmem:[%s3451_s9] sm:$0xff]  }
 0x9c5   :  { %2923 = vmatpush3.bf16.msra.mxu0 %v3117_v57 }
 0x9c6   :  { %v1060_v25 = vadd.f32 %v1058_v24, %v3303_v58  ;;  %v1063_v26 = vsel %vm253_vm4, %v1059_v23, 0.0  ;;  %v1071_v27 = vmul.f32 %v1059_v23, %v1059_v23  ;;  %v3118_v58 = vld [vmem:[%s3451_s9 + $0x8] sm:$0xff]   ;;  %2924 = vmatprep.subr.bf16.mxu0 %v3208_v1 }
 0x9c7   :  { %1064 = vadd.xlane.f32.xlu1 %v1063_v26 }
 0x9c8   :  { %v1066_v28 = vsel %vm253_vm4, %v1060_v25, 0.0  ;;  %v1072_v29 = vmul.f32 %v1060_v25, %v1060_v25  ;;  %v1073_v30 = vsel %vm253_vm4, %v1071_v27, 0.0 }
 0x9c9   :  { %1067 = vadd.xlane.f32.xlu0 %v1066_v28  ;;  %2925 = vmatpush3.bf16.msra.mxu0 %v3118_v58 }
 0x9ca   :  { %v1076_v31 = vsel %vm253_vm4, %v1072_v29, 0.0  ;;  %2942 = vmatprep.subr.bf16.mxu0 %v3208_v1 }
 0x9cb   :  { %1074 = vadd.xlane.f32.xlu1 %v1073_v30  ;;  %v2612_v30 = vld [vmem:[%s3497_s6] ss:$0 sm:$0xff] }
 0x9cd   :  { %1077 = vadd.xlane.f32.xlu0 %v1076_v31 }
 0xa54   :  { %v1065_v32 = vpop.xlane.xlu1 %1064 }
 0xa55   :  { %v1069_v33 = vmul.f32 0.03125, %v1065_v32 }
 0xa56   :  { %v1068_v34 = vpop.xlane.xlu0 %1067 }
 0xa57   :  { %v1070_v35 = vmul.f32 0.03125, %v1068_v34  ;;  %v1081_v37 = vmul.f32 %v1069_v33, %v1069_v33  ;;  %v1085_v46 = vsub.f32 %v1059_v23, %v1069_v33 }
 0xa58   :  { %v1075_v36 = vpop.xlane.xlu1 %1074 }
 0xa59   :  { %v1079_v60 = vmul.f32 0.03125, %v1075_v36  ;;  %v1082_v41 = vmul.f32 %v1070_v35, %v1070_v35  ;;  %v1086_v49 = vsub.f32 %v1060_v25, %v1070_v35 }
 0xa5a   :  { %v1078_v38 = vpop.xlane.xlu0 %1077 }
 0xa5b   :  { %v1083_v42 = vsub.f32 %v1079_v60, %v1081_v37  ;;  %v1080_v43 = vmul.f32 0.03125, %v1078_v38 }
 0xa5d   :  { %v1087_v12 = vadd.f32 1e-12, %v1083_v42  ;;  %v1084_v44 = vsub.f32 %v1080_v43, %v1082_v41 }
 0xa5f   :  { %3165 = vrsqrt.f32 %v1087_v12  ;;  %v1088_v45 = vadd.f32 1e-12, %v1084_v44  ;;  %v3123_v12 = vld [vmem:[%s3279_s17 + $0x20] sm:$0xff]  }
 0xa60   :  { %v3124_v44 = vld [vmem:[%s3293_s25 + $0x20] sm:$0xff]  }
 0xa61   :  { %3167 = vrsqrt.f32 %v1088_v45  ;;  %v3125_v45 = vld [vmem:[%s3279_s17 + $0x28] sm:$0xff]  }
 0xa69   :  { %v3166_v47 = vpop.eup %3165 }
 0xa6a   :  { %v1091_v50 = vmul.f32 %v3166_v47, %v1085_v46  ;;  %v3126_v46 = vld [vmem:[%s3293_s25 + $0x28] sm:$0xff]  }
 0xa6b   :  { %v3168_v51 = vpop.eup %3167 }
 0xa6c   :  { %v1092_v52 = vmul.f32 %v3168_v51, %v1086_v49  ;;  %v1099_v53 = vmul.f32 %v2606_v48, %v1091_v50 }
 0xa6e   :  { %v1100_v55 = vmul.f32 %v2606_v48, %v1092_v52  ;;  %v1107_v56 = vadd.f32 %v2607_v54, %v1099_v53 }
 0xa70   :  { %v1108_v59 = vadd.f32 %v2607_v54, %v1100_v55 }
 0xa72   :  { %v1109_v61 = vpack.c.bf16 %v1108_v59, %v1107_v56 }
 0xa74   :  { %2927 = vmatmul.mubr.msk.bf16.vlgmr.msra.gmra.mrb[20].mxu0 %vm253_vm4, %v1109_v61 }
 0xa75   :  { %2946 = vmatprep.mubr.msk.bf16.mxu0 %vm3210_vm0, %v3208_v1  ;;  %2943 = vmatpush3.bf16.msra.mxu0 %v3123_v12  ;;  %v3132_v12 = vld [vmem:[%s3293_s25 + $0x38] sm:$0xff]  }
 0xa76   :  { %2944 = vmatprep.subr.bf16.mxu0 %v3208_v1 }
 0xa79   :  { %2945 = vmatpush3.bf16.msra.mxu0 %v3125_v45 }
 0xa7a   :  { %2950 = vmatprep.subr.bf16.mxu0 %v3208_v1 }
 0xb47   :  { %v1170_v4 = vpop.f32.mrb[20].mxu0 }
 0xb48   :  { %v1171_v5 = vadd.f32 %v2608_v3, %v1170_v4  ;;  %v2928_v6 = vpop.f32.mrb[21].mxu0 }
 0xb49   :  { %v1173_v7 = vpop.f32.mrb[22].mxu0 }
 0xb4a   :  { %v1177_v8 = vmul.f32 %v1171_v5, %v1171_v5  ;;  %v1174_v9 = vadd.f32 %v2608_v3, %v1173_v7  ;;  %v2929_v10 = vpop.f32.mrb[23].mxu0  ;;  %v2618_v3 = vld [vmem:[%s3515_s13] ss:$0 sm:$0xff] }
 0xb4c   :  { %v1179_v11 = vmul.f32 %v1177_v8, %v1171_v5  ;;  %v1178_v13 = vmul.f32 %v1174_v9, %v1174_v9 }
 0xb4e   :  { %v1181_v14 = vmul.f32 0.044715, %v1179_v11  ;;  %v1180_v15 = vmul.f32 %v1178_v13, %v1174_v9 }
 0xb50   :  { %v1183_v16 = vadd.f32 %v1181_v14, %v1171_v5  ;;  %v1182_v17 = vmul.f32 0.044715, %v1180_v15  ;;  %v3127_v14 = vld [vmem:[%s3285_s21 + $0x20] sm:$0xff]  }
 0xb52   :  { %v1185_v18 = vmul.f32 0.7978846, %v1183_v16  ;;  %v1184_v19 = vadd.f32 %v1182_v17, %v1174_v9  ;;  %v3128_v16 = vld [vmem:[%s3285_s21 + $0x28] sm:$0xff]   ;;  %v2625_v17 = vld [vmem:[%s3332_s7 + $0x2] ss:$0 sm:$0xff] }
 0xb54   :  { %3169 = vtanh.f32 %v1185_v18  ;;  %v1186_v20 = vmul.f32 0.7978846, %v1184_v19  ;;  %v2643_v19 = vld [vmem:[%s3344_s15 + $0x2] ss:$0 sm:$0xff] }
 0xb56   :  { %3171 = vtanh.f32 %v1186_v20 }
 0xb5e   :  { %v3170_v21 = vpop.eup %3169 }
 0xb5f   :  { %v1189_v22 = vadd.f32 1.0, %v3170_v21 }
 0xb60   :  { %v3172_v23 = vpop.eup %3171 }
 0xb61   :  { %v1191_v24 = vmul.f32 0.5, %v1189_v22  ;;  %v1190_v25 = vadd.f32 1.0, %v3172_v23 }
 0xb63   :  { %v1192_v26 = vmul.f32 0.5, %v1190_v25  ;;  %v1193_v27 = vmul.f32 %v1191_v24, %v1171_v5 }
 0xb65   :  { %v1194_v28 = vmul.f32 %v1192_v26, %v1174_v9  ;;  %v2619_v9 = vld [vmem:[%s3520_s22] ss:$0 sm:$0xff] }
 0xb67   :  { %v1195_v29 = vpack.c.bf16 %v1194_v28, %v1193_v27 }
 0xb69   :  { %2939 = vmatmul.mubr.msk.bf16.vlgmr.msra.gmra.mrb[32].mxu1 %vm1235_vm6, %v1195_v29 }
 0xb6a   :  { %2962 = vmatprep.mubr.msk.bf16.mxu1 %vm3210_vm0, %v3208_v1  ;;  %2959 = vmatpush3.bf16.msra.mxu1 %v3124_v44 }
 0xb6b   :  { %2960 = vmatprep.subr.bf16.mxu1 %v3208_v1 }
 0xb6e   :  { %2961 = vmatpush3.bf16.msra.mxu1 %v3126_v46 }
 0xb6f   :  { %2972 = vmatprep.subr.bf16.mxu1 %v3208_v1 }
 0xc3c   :  { %v1273_v31 = vpop.f32.mrb[32].mxu1 }
 0xc3d   :  { %v1274_v57 = vadd.f32 %v2612_v30, %v1273_v31  ;;  %v2940_v58 = vpop.f32.mrb[33].mxu1 }
 0xc3e   :  { %v1276_v32 = vpop.f32.mrb[34].mxu1  ;;  %v2634_v58 = vld [vmem:[%s3338_s11 + $0x2] ss:$0 sm:$0xff] }
 0xc3f   :  { %v1280_v33 = vadd.f32 %v1274_v57, %v1107_v56  ;;  %v1277_v34 = vadd.f32 %v2612_v30, %v1276_v32  ;;  %v2941_v35 = vpop.f32.mrb[35].mxu1 }
 0xc41   :  { %v1281_v36 = vadd.f32 %v1277_v34, %v1108_v59  ;;  %v1284_v37 = vsel %vm253_vm4, %v1280_v33, 0.0  ;;  %v1292_v60 = vmul.f32 %v1280_v33, %v1280_v33 }
 0xc42   :  { %1285 = vadd.xlane.f32.xlu1 %v1284_v37 }
 0xc43   :  { %v1287_v38 = vsel %vm253_vm4, %v1281_v36, 0.0  ;;  %v1293_v41 = vmul.f32 %v1281_v36, %v1281_v36  ;;  %v1294_v42 = vsel %vm253_vm4, %v1292_v60, 0.0 }
 0xc44   :  { %1288 = vadd.xlane.f32.xlu0 %v1287_v38 }
 0xc45   :  { %v1297_v43 = vsel %vm253_vm4, %v1293_v41, 0.0  ;;  %v3129_v41 = vld [vmem:[%s3279_s17 + $0x30] sm:$0xff]  }
 0xc46   :  { %1295 = vadd.xlane.f32.xlu1 %v1294_v42  ;;  %v3130_v42 = vld [vmem:[%s3279_s17 + $0x38] sm:$0xff]   ;;  %s3233_s17 = smov 25  }
 0xc48   :  { %1298 = vadd.xlane.f32.xlu0 %v1297_v43  ;;  %v3131_v43 = vld [vmem:[%s3293_s25 + $0x30] sm:$0xff]  }
 0xccf   :  { %v1286_v47 = vpop.xlane.xlu1 %1285 }
 0xcd0   :  { %v1290_v48 = vmul.f32 0.03125, %v1286_v47 }
 0xcd1   :  { %v1289_v49 = vpop.xlane.xlu0 %1288 }
 0xcd2   :  { %v1291_v50 = vmul.f32 0.03125, %v1289_v49  ;;  %v1302_v52 = vmul.f32 %v1290_v48, %v1290_v48  ;;  %v1306_v0 = vsub.f32 %v1280_v33, %v1290_v48 }
 0xcd3   :  { %v1296_v51 = vpop.xlane.xlu1 %1295 }
 0xcd4   :  { %v1300_v53 = vmul.f32 0.03125, %v1296_v51  ;;  %v1303_v55 = vmul.f32 %v1291_v50, %v1291_v50  ;;  %v1307_v4 = vsub.f32 %v1281_v36, %v1291_v50 }
 0xcd5   :  { %v1299_v54 = vpop.xlane.xlu0 %1298 }
 0xcd6   :  { %v1304_v56 = vsub.f32 %v1300_v53, %v1302_v52  ;;  %v1301_v59 = vmul.f32 0.03125, %v1299_v54  ;;  %v2656_v52 = vld [vmem:[%s3332_s7 + $0x3] ss:$0 sm:$0xff]  ;;  %s3657_s7 = sld [smem:[%s3690_s0 + %s3233_s17]]  }
 0xcd8   :  { %v1308_v61 = vadd.f32 1e-12, %v1304_v56  ;;  %v1305_v62 = vsub.f32 %v1301_v59, %v1303_v55 }
 0xcda   :  { %3173 = vrsqrt.f32 %v1308_v61  ;;  %v1309_v63 = vadd.f32 1e-12, %v1305_v62 }
 0xcdc   :  { %3175 = vrsqrt.f32 %v1309_v63  ;;  %v2674_v63 = vld [vmem:[%s3344_s15 + $0x3] ss:$0 sm:$0xff] }
 0xce4   :  { %v3174_v2 = vpop.eup %3173 }
 0xce5   :  { %v1312_v5 = vmul.f32 %v3174_v2, %v1306_v0 }
 0xce6   :  { %v3176_v6 = vpop.eup %3175 }
 0xce7   :  { %v1320_v7 = vmul.f32 %v2618_v3, %v1312_v5  ;;  %v1313_v8 = vmul.f32 %v3176_v6, %v1307_v4 }
 0xce9   :  { %v1321_v10 = vmul.f32 %v2618_v3, %v1313_v8  ;;  %v3524_v11 = vadd.f32 %v2619_v9, %v1320_v7 }
 0xceb   :  { %v3526_v13 = vadd.f32 %v2619_v9, %v1321_v10 }
 0xced   :  { %v3531_v15 = vpack.c.bf16 %v3526_v13, %v3524_v11 }
 0xcef   :  { %2947 = vmatmul.mubr.msk.bf16.vlgmr.msra.gmra.mrb[24].mxu0 %vm253_vm4, %v3531_v15  ;;  %2963 = vmatmul.mubr.msk.bf16.vlgmr.msra.gmra.mrb[36].mxu1 %vm253_vm4, %v3531_v15 }
 0xcf0   :  { %2951 = vmatpush3.bf16.msra.mxu0 %v3127_v14  ;;  %2954 = vmatprep.mubr.msk.bf16.mxu0 %vm3210_vm0, %v3208_v1 }
 0xcf1   :  { %2952 = vmatprep.subr.bf16.mxu0 %v3208_v1  ;;  %2974 = vmatprep.mubr.msk.bf16.mxu1 %vm3210_vm0, %v3208_v1 }
 0xcf4   :  { %2953 = vmatpush3.bf16.msra.mxu0 %v3128_v16 }
 0xcf5   :  { %2966 = vmatprep.subr.bf16.mxu0 %v3208_v1 }
 0xcf7   :  { %2955 = vmatmul.mubr.msk.bf16.vlgmr.msra.gmra.mrb[28].mxu0 %vm253_vm4, %v3531_v15 }
 0xcf8   :  { %2968 = vmatprep.mubr.msk.bf16.mxu0 %vm3210_vm0, %v3208_v1 }
 0xdc2   :  { %v1393_v18 = vpop.f32.mrb[24].mxu0  ;;  %v1525_v20 = vpop.f32.mrb[36].mxu1 }
 0xdc3   :  { %v2948_v21 = vpop.f32.mrb[25].mxu0  ;;  %v2964_v22 = vpop.f32.mrb[37].mxu1  ;;  %v1394_v25 = vadd.f32 %v2625_v17, %v1393_v18  ;;  %v1526_v26 = vadd.f32 %v2643_v19, %v1525_v20 }
 0xdc4   :  { %v1396_v23 = vpop.f32.mrb[26].mxu0  ;;  %v1528_v24 = vpop.f32.mrb[38].mxu1 }
 0xdc5   :  { %v1397_v27 = vadd.f32 %v2625_v17, %v1396_v23  ;;  %v1529_v28 = vadd.f32 %v2643_v19, %v1528_v24  ;;  %v2949_v29 = vpop.f32.mrb[27].mxu0  ;;  %v2965_v30 = vpop.f32.mrb[39].mxu1 }
 0xdc6   :  { %v3134_v30 = vld [vmem:[%s3285_s21 + $0x38] sm:$0xff]  }
 0xdc7   :  { %v1532_v31 = vpack.c.bf16 %v1397_v27, %v1394_v25  ;;  %v1604_v57 = vpack.c.bf16 %v1529_v28, %v1526_v26  ;;  %v3133_v28 = vld [vmem:[%s3285_s21 + $0x30] sm:$0xff]   ;;  %s2542_s21 = sld [smem:[%s3690_s0 + %s3240_s19]]  }
 0xdc9   :  { %2973 = vmatpush3.bf16.msra.mxu1 %v1604_v57 }
 0xdca   :  { %v1459_v32 = vpop.f32.mrb[28].mxu0  ;;  %2986 = vmatprep.subr.bf16.mxu1 %v3208_v1 }
 0xdcb   :  { %v2956_v33 = vpop.f32.mrb[29].mxu0  ;;  %v1460_v35 = vadd.f32 %v2634_v58, %v1459_v32 }
 0xdcc   :  { %v1462_v34 = vpop.f32.mrb[30].mxu0 }
 0xdcd   :  { %v1463_v36 = vadd.f32 %v2634_v58, %v1462_v34  ;;  %v2957_v37 = vpop.f32.mrb[31].mxu0  ;;  %v2665_v34 = vld [vmem:[%s3338_s11 + $0x3] ss:$0 sm:$0xff]  ;;  %s3234_s11 = smov 4  }
 0xdcf   :  { %v1533_v60 = vpack.c.bf16 %v1463_v36, %v1460_v35 }
 0xdd1   :  { %v1538_v38 = vsel %vm512_vm5, %v1533_v60, 0 }
 0xdd2   :  { %2967 = vmatpush3.bf16.xpose.msra.mxu0 %v1538_v38 }
 0xdd3   :  { %2978 = vmatprep.subr.bf16.mxu0 %v3208_v1 }
 0xdd9   :  { %2969 = vmatmul.mubr.msk.bf16.vlgmr.msra.gmra.mrb[32].mxu0 %vm512_vm5, %v1532_v31 }
 0xdda   :  { %2979 = vmatpush3.bf16.msra.mxu0 %v3129_v41  ;;  %2982 = vmatprep.mubr.msk.bf16.mxu0 %vm3210_vm0, %v3208_v1 }
 0xddb   :  { %2980 = vmatprep.subr.bf16.mxu0 %v3208_v1 }
 0xdde   :  { %2981 = vmatpush3.bf16.msra.mxu0 %v3130_v42 }
 0xddf   :  { %2994 = vmatprep.subr.bf16.mxu0 %v3208_v1 }
 0xde1   :  { %2983 = vmatmul.mubr.msk.bf16.vlgmr.msra.gmra.mrb[36].mxu0 %vm253_vm4, %v3531_v15 }
 0xde2   :  { %2995 = vmatpush3.bf16.msra.mxu0 %v3131_v43  ;;  %2998 = vmatprep.mubr.msk.bf16.mxu0 %vm3210_vm0, %v3208_v1 }
 0xde3   :  { %2996 = vmatprep.subr.bf16.mxu0 %v3208_v1 }
 0xde6   :  { %2997 = vmatpush3.bf16.msra.mxu0 %v3132_v12 }
 0xde7   :  { %3008 = vmatprep.subr.bf16.mxu0 %v3208_v1 }
 0xde9   :  { %2999 = vmatmul.mubr.msk.bf16.vlgmr.msra.gmra.mrb[40].mxu0 %vm253_vm4, %v3531_v15 }
 0xdea   :  { %3010 = vmatprep.mubr.msk.bf16.mxu0 %vm3210_vm0, %v3208_v1 }
 0xeac   :  { %v1574_v44 = vpop.f32.mrb[32].mxu0 }
 0xead   :  { %v1575_v45 = vadd.f32 %v1574_v44, %v3376_v39  ;;  %v2970_v46 = vpop.f32.mrb[33].mxu0 }
 0xeae   :  { %v1577_v47 = vpop.f32.mrb[34].mxu0 }
 0xeaf   :  { %v1578_v48 = vadd.f32 %v1577_v47, %v3378_v40  ;;  %v2971_v49 = vpop.f32.mrb[35].mxu0  ;;  %v1581_v50 = vsel %vm512_vm5, %v1575_v45, -inf }
 0xeb0   :  { %1582 = vmax.xlane.f32.xlu1 %v1581_v50 }
 0xeb1   :  { %v1584_v51 = vsel %vm512_vm5, %v1578_v48, -inf }
 0xeb2   :  { %1585 = vmax.xlane.f32.xlu0 %v1584_v51 }
 0xeb4   :  { %v1712_v53 = vpop.f32.mrb[36].mxu0 }
 0xeb5   :  { %v2984_v54 = vpop.f32.mrb[37].mxu0  ;;  %v3578_v56 = vadd.f32 %v2656_v52, %v1712_v53 }
 0xeb6   :  { %v1715_v55 = vpop.f32.mrb[38].mxu0 }
 0xeb7   :  { %v3580_v59 = vadd.f32 %v2656_v52, %v1715_v55  ;;  %v2985_v61 = vpop.f32.mrb[39].mxu0 }
 0xeb9   :  { %v1851_v62 = vpack.c.bf16 %v3580_v59, %v3578_v56 }
 0xebc   :  { %v1844_v0 = vpop.f32.mrb[40].mxu0 }
 0xebd   :  { %v3000_v2 = vpop.f32.mrb[41].mxu0  ;;  %v1845_v4 = vadd.f32 %v2674_v63, %v1844_v0 }
 0xebe   :  { %v1847_v3 = vpop.f32.mrb[42].mxu0 }
 0xebf   :  { %v1848_v5 = vadd.f32 %v2674_v63, %v1847_v3  ;;  %v3001_v6 = vpop.f32.mrb[43].mxu0 }
 0xec0   :  { %v3136_v6 = vld [vmem:[%s3421_s30 + $0x18] sm:$0xff]  }
 0xec1   :  { %v1923_v7 = vpack.c.bf16 %v1848_v5, %v1845_v4  ;;  %v3135_v4 = vld [vmem:[%s3421_s30 + $0x10] sm:$0xff]  }
 0xec3   :  { %3009 = vmatpush3.bf16.msra.mxu0 %v1923_v7 }
 0xec4   :  { %3020 = vmatprep.subr.bf16.mxu0 %v3208_v1 }
 0xf3d   :  { %v1583_v8 = vpop.xlane.xlu1 %1582 }
 0xf3e   :  { %v1587_v9 = vsub.f32 %v1575_v45, %v1583_v8 }
 0xf3f   :  { %v1586_v10 = vpop.xlane.xlu0 %1585 }
 0xf40   :  { %v1589_v14 = vmul.f32 1.442695, %v1587_v9  ;;  %v1588_v16 = vsub.f32 %v1578_v48, %v1586_v10 }
 0xf42   :  { %3177 = vpow2.f32 %v1589_v14  ;;  %v1591_v17 = vmul.f32 1.442695, %v1588_v16 }
 0xf44   :  { %3179 = vpow2.f32 %v1591_v17 }
 0xf4c   :  { %v3178_v18 = vpop.eup %3177 }
 0xf4d   :  { %v1593_v19 = vsel %vm512_vm5, %v3178_v18, 0.0 }
 0xf4e   :  { %v3180_v20 = vpop.eup %3179  ;;  %1594 = vadd.xlane.f32.xlu1 %v1593_v19 }
 0xf4f   :  { %v1596_v21 = vsel %vm512_vm5, %v3180_v20, 0.0 }
 0xf50   :  { %1597 = vadd.xlane.f32.xlu0 %v1596_v21  ;;  %v2687_v21 = vld [vmem:[%s3439_s4 + $0x1] ss:$0 sm:$0xff]  ;;  %s2516_s4 = sld [smem:[%s3690_s0 + %s3234_s11]]  }
 0xfdb   :  { %v1595_v22 = vpop.xlane.xlu1 %1594 }
 0xfdc   :  { %3181 = vrcp.f32 %v1595_v22 }
 0xfdd   :  { %v1598_v23 = vpop.xlane.xlu0 %1597 }
 0xfde   :  { %3183 = vrcp.f32 %v1598_v23 }
 0xfe6   :  { %v3182_v24 = vpop.eup %3181 }
 0xfe7   :  { %v1601_v26 = vmul.f32 %v3182_v24, %v3178_v18 }
 0xfe8   :  { %v3184_v25 = vpop.eup %3183 }
 0xfe9   :  { %v1602_v27 = vmul.f32 %v3184_v25, %v3180_v20 }
 0xfeb   :  { %v1603_v29 = vpack.c.bf16 %v1602_v27, %v1601_v26 }
 0xfed   :  { %2975 = vmatmul.mubr.msk.bf16.vlgmr.msra.gmra.mrb[40].mxu1 %vm512_vm5, %v1603_v29 }
 0xfee   :  { %2987 = vmatpush3.bf16.msra.mxu1 %v3133_v28  ;;  %2990 = vmatprep.mubr.msk.bf16.mxu1 %vm3210_vm0, %v3208_v1 }
 0xfef   :  { %2988 = vmatprep.subr.bf16.mxu1 %v3208_v1 }
 0xff2   :  { %2989 = vmatpush3.bf16.msra.mxu1 %v3134_v30 }
 0xff3   :  { %3002 = vmatprep.subr.bf16.mxu1 %v3208_v1 }
 0xff5   :  { %2991 = vmatmul.mubr.msk.bf16.vlgmr.msra.gmra.mrb[44].mxu1 %vm253_vm4, %v3531_v15 }
 0xff6   :  { %3004 = vmatprep.mubr.msk.bf16.mxu1 %vm3210_vm0, %v3208_v1 }
0x10c0   :  { %v1642_v31 = vpop.f32.mrb[40].mxu1 }
0x10c1   :  { %v2976_v57 = vpop.f32.mrb[41].mxu1 }
0x10c2   :  { %v1645_v58 = vpop.f32.mrb[42].mxu1 }
0x10c3   :  { %v1649_v32 = vpack.c.bf16 %v1645_v58, %v1642_v31  ;;  %v2977_v33 = vpop.f32.mrb[43].mxu1 }
0x10c8   :  { %v1778_v35 = vpop.f32.mrb[44].mxu1 }
0x10c9   :  { %v2992_v36 = vpop.f32.mrb[45].mxu1  ;;  %v1779_v60 = vadd.f32 %v2665_v34, %v1778_v35  ;;  %v3137_v35 = vld [vmem:[%s3451_s9 + $0x10] sm:$0xff]  }
0x10ca   :  { %v1781_v37 = vpop.f32.mrb[46].mxu1 }
0x10cb   :  { %v1782_v38 = vadd.f32 %v2665_v34, %v1781_v37  ;;  %v2993_v41 = vpop.f32.mrb[47].mxu1 }
0x10cd   :  { %v1852_v42 = vpack.c.bf16 %v1782_v38, %v1779_v60 }
0x10cf   :  { %v1857_v43 = vsel %vm512_vm5, %v1852_v42, 0 }
0x10d0   :  { %3003 = vmatpush3.bf16.xpose.msra.mxu1 %v1857_v43 }
0x10d1   :  { %3014 = vmatprep.subr.bf16.mxu1 %v3208_v1 }
0x10d7   :  { %3005 = vmatmul.mubr.msk.bf16.vlgmr.msra.gmra.mrb[48].mxu1 %vm512_vm5, %v1851_v62 }
0x10d8   :  { %3016 = vmatprep.mubr.msk.bf16.mxu1 %vm3210_vm0, %v3208_v1  ;;  %3015 = vmatpush3.bf16.msra.mxu1 %v3136_v6 }
0x10d9   :  { %3026 = vmatprep.subr.bf16.mxu1 %v3208_v1 }
0x11aa   :  { %v1893_v15 = vpop.f32.mrb[48].mxu1 }
0x11ab   :  { %v1894_v12 = vadd.f32 %v1893_v15, %v3376_v39  ;;  %v3006_v44 = vpop.f32.mrb[49].mxu1 }
0x11ac   :  { %v1896_v45 = vpop.f32.mrb[50].mxu1 }
0x11ad   :  { %v1897_v46 = vadd.f32 %v1896_v45, %v3378_v40  ;;  %v3007_v47 = vpop.f32.mrb[51].mxu1  ;;  %v1900_v48 = vsel %vm512_vm5, %v1894_v12, -inf }
0x11ae   :  { %1901 = vmax.xlane.f32.xlu1 %v1900_v48 }
0x11af   :  { %v1903_v49 = vsel %vm512_vm5, %v1897_v46, -inf }
0x11b0   :  { %1904 = vmax.xlane.f32.xlu0 %v1903_v49 }
0x123b   :  { %v1902_v50 = vpop.xlane.xlu1 %1901 }
0x123c   :  { %v1906_v51 = vsub.f32 %v1894_v12, %v1902_v50  ;;  %v2690_v50 = vld [vmem:[%s3460_s14 + $0x1] ss:$0 sm:$0xff] }
0x123d   :  { %v1905_v52 = vpop.xlane.xlu0 %1904 }
0x123e   :  { %v1908_v53 = vmul.f32 1.442695, %v1906_v51  ;;  %v1907_v54 = vsub.f32 %v1897_v46, %v1905_v52 }
0x1240   :  { %3185 = vpow2.f32 %v1908_v53  ;;  %v1910_v55 = vmul.f32 1.442695, %v1907_v54 }
0x1242   :  { %3187 = vpow2.f32 %v1910_v55 }
0x124a   :  { %v3186_v39 = vpop.eup %3185 }
0x124b   :  { %v1912_v56 = vsel %vm512_vm5, %v3186_v39, 0.0 }
0x124c   :  { %v3188_v40 = vpop.eup %3187  ;;  %1913 = vadd.xlane.f32.xlu1 %v1912_v56 }
0x124d   :  { %v1915_v59 = vsel %vm512_vm5, %v3188_v40, 0.0 }
0x124e   :  { %1916 = vadd.xlane.f32.xlu0 %v1915_v59 }
0x12d9   :  { %v1914_v61 = vpop.xlane.xlu1 %1913 }
0x12da   :  { %3189 = vrcp.f32 %v1914_v61 }
0x12db   :  { %v1917_v62 = vpop.xlane.xlu0 %1916 }
0x12dc   :  { %3191 = vrcp.f32 %v1917_v62  ;;  %v3139_v62 = vld [vmem:[%s3475_s26 + $0x20] sm:$0xff]  }
0x12e4   :  { %v3190_v63 = vpop.eup %3189 }
0x12e5   :  { %v1920_v2 = vmul.f32 %v3190_v63, %v3186_v39  ;;  %v2691_v39 = vld [vmem:[%s3465_s20 + $0x1] ss:$0 sm:$0xff]  ;;  %v3140_v63 = vld [vmem:[%s3475_s26 + $0x28] sm:$0xff]  }
0x12e6   :  { %v3192_v0 = vpop.eup %3191 }
0x12e7   :  { %v1921_v3 = vmul.f32 %v3192_v0, %v3188_v40  ;;  %v3141_v0 = vld [vmem:[%s3475_s26 + $0x30] sm:$0xff]  }
0x12e9   :  { %v1922_v5 = vpack.c.bf16 %v1921_v3, %v1920_v2  ;;  %v3142_v2 = vld [vmem:[%s3475_s26 + $0x38] sm:$0xff]   ;;  %v2697_v3 = vld [vmem:[%s3488_s1 + $0x1] ss:$0 sm:$0xff] }
0x12eb   :  { %3011 = vmatmul.mubr.msk.bf16.vlgmr.msra.gmra.mrb[44].mxu0 %vm512_vm5, %v1922_v5 }
0x12ec   :  { %3021 = vmatpush3.bf16.msra.mxu0 %v3135_v4  ;;  %3022 = vmatprep.mubr.msk.bf16.mxu0 %vm3210_vm0, %v3208_v1 }
0x12ed   :  { %3034 = vmatprep.subr.bf16.mxu0 %v3208_v1 }
0x12f3   :  { %3023 = vmatmul.mubr.msk.bf16.vlgmr.msra.gmra.mrb[48].mxu0 %vm512_vm5, %v1649_v32 }
0x12f4   :  { %3042 = vmatprep.mubr.msk.bf16.mxu0 %vm3210_vm0, %v3208_v1  ;;  %3035 = vmatpush3.bf16.msra.mxu0 %v3139_v62 }
0x12f5   :  { %3036 = vmatprep.subr.bf16.mxu0 %v3208_v1 }
0x12f8   :  { %3037 = vmatpush3.bf16.msra.mxu0 %v3140_v63 }
0x12f9   :  { %3038 = vmatprep.subr.bf16.mxu0 %v3208_v1 }
0x12fc   :  { %3039 = vmatpush3.bf16.msra.mxu0 %v3141_v0 }
0x12fd   :  { %3040 = vmatprep.subr.bf16.mxu0 %v3208_v1 }
0x1300   :  { %3041 = vmatpush3.bf16.msra.mxu0 %v3142_v2 }
0x13be   :  { %v1961_v7 = vpop.f32.mrb[44].mxu0 }
0x13bf   :  { %v3012_v8 = vpop.f32.mrb[45].mxu0 }
0x13c0   :  { %v1964_v9 = vpop.f32.mrb[46].mxu0 }
0x13c1   :  { %v1968_v10 = vpack.c.bf16 %v1964_v9, %v1961_v7  ;;  %v3013_v14 = vpop.f32.mrb[47].mxu0 }
0x13c3   :  { %3017 = vmatmul.mubr.msk.bf16.vlgmr.msra.gmra.mrb[52].mxu1 %vm512_vm5, %v1968_v10 }
0x13c4   :  { %3030 = vmatprep.mubr.msk.bf16.mxu1 %vm3210_vm0, %v3208_v1  ;;  %3027 = vmatpush3.bf16.msra.mxu1 %v3137_v35 }
0x13c5   :  { %3028 = vmatprep.subr.bf16.mxu1 %v3208_v1 }
0x13c6   :  { %v2065_v16 = vpop.f32.mrb[48].mxu0 }
0x13c7   :  { %v3024_v17 = vpop.f32.mrb[49].mxu0 }
0x13c8   :  { %v2068_v18 = vpop.f32.mrb[50].mxu0 }
0x13c9   :  { %v3025_v19 = vpop.f32.mrb[51].mxu0 }
0x1496   :  { %v2015_v20 = vpop.f32.mrb[52].mxu1 }
0x1497   :  { %v2066_v22 = vadd.f32 %v2065_v16, %v2015_v20  ;;  %v3018_v23 = vpop.f32.mrb[53].mxu1 }
0x1498   :  { %v2018_v24 = vpop.f32.mrb[54].mxu1 }
0x1499   :  { %v2080_v25 = vadd.f32 %v2687_v21, %v2066_v22  ;;  %v2069_v26 = vadd.f32 %v2068_v18, %v2018_v24  ;;  %v3019_v27 = vpop.f32.mrb[55].mxu1 }
0x149b   :  { %v2082_v28 = vadd.f32 %v2080_v25, %v3524_v11  ;;  %v2081_v29 = vadd.f32 %v2687_v21, %v2069_v26  ;;  %v3138_v11 = vld [vmem:[%s3451_s9 + $0x18] sm:$0xff]   ;;  %s3235_s9 = smov 2  }
0x149c   :  { %3029 = vmatpush3.bf16.msra.mxu1 %v3138_v11  ;;  %s2514_s23 = sld [smem:[%s3690_s0 + %s3235_s9]]  }
0x149d   :  { %v2083_v30 = vadd.f32 %v2081_v29, %v3526_v13  ;;  %v2088_v31 = vsel %vm253_vm4, %v2082_v28, 0.0  ;;  %v2096_v57 = vmul.f32 %v2082_v28, %v2082_v28  ;;  %3046 = vmatprep.subr.bf16.mxu1 %v3208_v1 }
0x149e   :  { %2089 = vadd.xlane.f32.xlu1 %v2088_v31 }
0x149f   :  { %v2091_v58 = vsel %vm253_vm4, %v2083_v30, 0.0  ;;  %v2097_v32 = vmul.f32 %v2083_v30, %v2083_v30  ;;  %v2098_v33 = vsel %vm253_vm4, %v2096_v57, 0.0 }
0x14a0   :  { %2092 = vadd.xlane.f32.xlu0 %v2091_v58  ;;  %v2710_v58 = vld [vmem:[%s3497_s6 + $0x1] ss:$0 sm:$0xff] }
0x14a1   :  { %v2101_v34 = vsel %vm253_vm4, %v2097_v32, 0.0 }
0x14a2   :  { %2099 = vadd.xlane.f32.xlu1 %v2098_v33 }
0x14a4   :  { %2102 = vadd.xlane.f32.xlu0 %v2101_v34 }
0x152b   :  { %v2090_v13 = vpop.xlane.xlu1 %2089 }
0x152c   :  { %v2094_v36 = vmul.f32 0.03125, %v2090_v13 }
0x152d   :  { %v2093_v37 = vpop.xlane.xlu0 %2092 }
0x152e   :  { %v2095_v60 = vmul.f32 0.03125, %v2093_v37  ;;  %v2106_v41 = vmul.f32 %v2094_v36, %v2094_v36  ;;  %v2110_v48 = vsub.f32 %v2082_v28, %v2094_v36 }
0x152f   :  { %v2100_v38 = vpop.xlane.xlu1 %2099 }
0x1530   :  { %v2104_v42 = vmul.f32 0.03125, %v2100_v38  ;;  %v2107_v15 = vmul.f32 %v2095_v60, %v2095_v60  ;;  %v2111_v51 = vsub.f32 %v2083_v30, %v2095_v60 }
0x1531   :  { %v2103_v43 = vpop.xlane.xlu0 %2102 }
0x1532   :  { %v2108_v12 = vsub.f32 %v2104_v42, %v2106_v41  ;;  %v2105_v44 = vmul.f32 0.03125, %v2103_v43 }
0x1534   :  { %v2112_v45 = vadd.f32 1e-12, %v2108_v12  ;;  %v2109_v46 = vsub.f32 %v2105_v44, %v2107_v15 }
0x1536   :  { %3193 = vrsqrt.f32 %v2112_v45  ;;  %v2113_v47 = vadd.f32 1e-12, %v2109_v46 }
0x1538   :  { %3195 = vrsqrt.f32 %v2113_v47 }
0x1540   :  { %v3194_v49 = vpop.eup %3193 }
0x1541   :  { %v2116_v52 = vmul.f32 %v3194_v49, %v2110_v48 }
0x1542   :  { %v3196_v53 = vpop.eup %3195 }
0x1543   :  { %v2117_v54 = vmul.f32 %v3196_v53, %v2111_v51  ;;  %v2124_v55 = vmul.f32 %v2690_v50, %v2116_v52 }
0x1545   :  { %v2125_v56 = vmul.f32 %v2690_v50, %v2117_v54  ;;  %v2132_v40 = vadd.f32 %v2691_v39, %v2124_v55 }
0x1547   :  { %v2133_v59 = vadd.f32 %v2691_v39, %v2125_v56 }
0x1549   :  { %v2134_v61 = vpack.c.bf16 %v2133_v59, %v2132_v40 }
0x154b   :  { %3031 = vmatmul.mubr.msk.bf16.vlgmr.msra.gmra.mrb[56].mxu1 %vm253_vm4, %v2134_v61 }
0x154c   :  { %3048 = vmatprep.mubr.msk.bf16.mxu1 %vm3210_vm0, %v3208_v1 }
0x161e   :  { %v2197_v4 = vpop.f32.mrb[56].mxu1 }
0x161f   :  { %v2198_v5 = vadd.f32 %v2697_v3, %v2197_v4  ;;  %v3032_v6 = vpop.f32.mrb[57].mxu1 }
0x1620   :  { %v2200_v7 = vpop.f32.mrb[58].mxu1 }
0x1621   :  { %v2204_v8 = vmul.f32 %v2198_v5, %v2198_v5  ;;  %v2201_v9 = vadd.f32 %v2697_v3, %v2200_v7  ;;  %v3033_v10 = vpop.f32.mrb[59].mxu1  ;;  %v2719_v3 = vld [vmem:[%s3520_s22 + $0x1] ss:$0 sm:$0xff] }
0x1622   :  { %v3144_v10 = vld [vmem:[%s3657_s7 + $0x8] sm:$0xff]  }
0x1623   :  { %v2206_v14 = vmul.f32 %v2204_v8, %v2198_v5  ;;  %v2205_v16 = vmul.f32 %v2201_v9, %v2201_v9  ;;  %v2360_v8 = vld [vmem:[%s2516_s4] sm:$0x1] }
0x1625   :  { %v2208_v17 = vmul.f32 0.044715, %v2206_v14  ;;  %v2207_v18 = vmul.f32 %v2205_v16, %v2201_v9 }
0x1627   :  { %v2210_v19 = vadd.f32 %v2208_v17, %v2198_v5  ;;  %v2209_v20 = vmul.f32 0.044715, %v2207_v18 }
0x1629   :  { %v2212_v21 = vmul.f32 0.7978846, %v2210_v19  ;;  %v2211_v22 = vadd.f32 %v2209_v20, %v2201_v9  ;;  %v2726_v20 = vld [vmem:[%s2540_s28] ss:$0 sm:$0xff] }
0x162b   :  { %3197 = vtanh.f32 %v2212_v21  ;;  %v2213_v23 = vmul.f32 0.7978846, %v2211_v22 }
0x162d   :  { %3199 = vtanh.f32 %v2213_v23  ;;  %v2721_v23 = vld [vmem:[%s2538_s3] ss:$0 sm:$0xff] }
0x1635   :  { %v3198_v24 = vpop.eup %3197 }
0x1636   :  { %v2216_v25 = vadd.f32 1.0, %v3198_v24 }
0x1637   :  { %v3200_v26 = vpop.eup %3199 }
0x1638   :  { %v2218_v27 = vmul.f32 0.5, %v2216_v25  ;;  %v2217_v28 = vadd.f32 1.0, %v3200_v26 }
0x163a   :  { %v2219_v29 = vmul.f32 0.5, %v2217_v28  ;;  %v2220_v30 = vmul.f32 %v2218_v27, %v2198_v5 }
0x163c   :  { %v2221_v31 = vmul.f32 %v2219_v29, %v2201_v9  ;;  %v3143_v9 = vld [vmem:[%s3657_s7] sm:$0xff]  }
0x163d   :  { %v2725_v29 = vld [vmem:[%s2539_s10] ss:$0 sm:$0xff] }
0x163e   :  { %v2222_v57 = vpack.c.bf16 %v2221_v31, %v2220_v30 }
0x1640   :  { %3043 = vmatmul.mubr.msk.bf16.vlgmr.msra.gmra.mrb[52].mxu0 %vm1235_vm6, %v2222_v57 }
0x1713   :  { %v2301_v32 = vpop.f32.mrb[52].mxu0 }
0x1714   :  { %v2302_v33 = vadd.f32 %v2710_v58, %v2301_v32  ;;  %v3044_v34 = vpop.f32.mrb[53].mxu0 }
0x1715   :  { %v2304_v35 = vpop.f32.mrb[54].mxu0 }
0x1716   :  { %v2308_v11 = vadd.f32 %v2302_v33, %v2132_v40  ;;  %v2305_v13 = vadd.f32 %v2710_v58, %v2304_v35  ;;  %v3045_v36 = vpop.f32.mrb[55].mxu0  ;;  %v66_v58 = vstv %s2541_s18 }
0x1717   :  { %67 = vst [vmem:[#allocation2] sm:$0x1] %v66_v58 }
0x1718   :  { %v2309_v37 = vadd.f32 %v2305_v13, %v2133_v59  ;;  %v2314_v60 = vsel %vm253_vm4, %v2308_v11, 0.0  ;;  %v2322_v38 = vmul.f32 %v2308_v11, %v2308_v11  ;;  %v2718_v59 = vld [vmem:[%s3515_s13 + $0x1] ss:$0 sm:$0xff] }
0x1719   :  { %2315 = vadd.xlane.f32.xlu1 %v2314_v60 }
0x171a   :  { %v2317_v41 = vsel %vm253_vm4, %v2309_v37, 0.0  ;;  %v2323_v42 = vmul.f32 %v2309_v37, %v2309_v37  ;;  %v2324_v43 = vsel %vm253_vm4, %v2322_v38, 0.0 }
0x171b   :  { %2318 = vadd.xlane.f32.xlu0 %v2317_v41 }
0x171c   :  { %v2327_v15 = vsel %vm253_vm4, %v2323_v42, 0.0 }
0x171d   :  { %2325 = vadd.xlane.f32.xlu1 %v2324_v43 }
0x171e   :  { %v2727_v34 = vld [vmem:[#allocation2] ss:$0 sm:$0xff] }
0x171f   :  { %2328 = vadd.xlane.f32.xlu0 %v2327_v15 }
0x17a6   :  { %v2316_v12 = vpop.xlane.xlu1 %2315 }
0x17a7   :  { %v2320_v44 = vmul.f32 0.03125, %v2316_v12 }
0x17a8   :  { %v2319_v45 = vpop.xlane.xlu0 %2318 }
0x17a9   :  { %v2321_v46 = vmul.f32 0.03125, %v2319_v45  ;;  %v2332_v48 = vmul.f32 %v2320_v44, %v2320_v44  ;;  %v2336_v56 = vsub.f32 %v2308_v11, %v2320_v44 }
0x17aa   :  { %v2326_v47 = vpop.xlane.xlu1 %2325 }
0x17ab   :  { %v2330_v49 = vmul.f32 0.03125, %v2326_v47  ;;  %v2333_v51 = vmul.f32 %v2321_v46, %v2321_v46  ;;  %v2337_v61 = vsub.f32 %v2309_v37, %v2321_v46 }
0x17ac   :  { %v2329_v50 = vpop.xlane.xlu0 %2328 }
0x17ad   :  { %v2334_v52 = vsub.f32 %v2330_v49, %v2332_v48  ;;  %v2331_v53 = vmul.f32 0.03125, %v2329_v50 }
0x17af   :  { %v2338_v54 = vadd.f32 1e-12, %v2334_v52  ;;  %v2335_v55 = vsub.f32 %v2331_v53, %v2333_v51 }
0x17b1   :  { %3201 = vrsqrt.f32 %v2338_v54  ;;  %v2339_v39 = vadd.f32 1e-12, %v2335_v55 }
0x17b3   :  { %3203 = vrsqrt.f32 %v2339_v39 }
0x17bb   :  { %v3202_v40 = vpop.eup %3201 }
0x17bc   :  { %v2342_v62 = vmul.f32 %v3202_v40, %v2336_v56 }
0x17bd   :  { %v3204_v63 = vpop.eup %3203 }
0x17be   :  { %v2343_v0 = vmul.f32 %v3204_v63, %v2337_v61  ;;  %v2350_v2 = vmul.f32 %v2718_v59, %v2342_v62 }
0x17c0   :  { %v2351_v4 = vmul.f32 %v2718_v59, %v2343_v0  ;;  %v2358_v5 = vadd.f32 %v2719_v3, %v2350_v2 }
0x17c2   :  { %v2359_v6 = vadd.f32 %v2719_v3, %v2351_v4 }
0x17c4   :  { %v2361_v7 = vpack.c.bf16 %v2359_v6, %v2358_v5 }
0x17c6   :  { %3047 = vmatpush3.bf16.msra.mxu1 %v2361_v7 }
0x17c7   :  { %3052 = vmatprep.subr.bf16.mxu1 %v3208_v1 }
0x17c9   :  { %3049 = vmatmul.mubr.msk.bf16.vlgmr.msra.gmra.mrb[60].mxu1 %vm512_vm5, %v2360_v8 }
0x17ca   :  { %3053 = vmatpush3.bf16.msra.mxu1 %v3143_v9  ;;  %3056 = vmatprep.mubr.msk.bf16.mxu1 %vm3210_vm0, %v3208_v1 }
0x17cb   :  { %3054 = vmatprep.subr.bf16.mxu1 %v3208_v1  ;;  %v2485_v1 = vld [vmem:[%s2514_s23] sm:$0x3] }
0x17cc   :  { %v2493_v21 = vmul.f32 %v2726_v20, %v2485_v1 }
0x17ce   :  { %3055 = vmatpush3.bf16.msra.mxu1 %v3144_v10  ;;  %v2495_v22 = vsel %vm2494_vm7, %v2493_v21, 0.0 }
0x17cf   :  { %2496 = vadd.xlane.f32.xlu0 %v2495_v22 }
0x185c   :  { %v2497_v32 = vpop.xlane.xlu0 %2496 }
0x189c   :  { %v2399_v14 = vpop.f32.mrb[60].mxu1 }
0x189d   :  { %v2405_v16 = vpack.c.bf16 %v2399_v14, %v2399_v14  ;;  %v3050_v17 = vpop.f32.mrb[61].mxu1 }
0x189e   :  { %v2402_v18 = vpop.f32.mrb[62].mxu1 }
0x189f   :  { %v3051_v19 = vpop.f32.mrb[63].mxu1  ;;  %3057 = vmatmul.mubr.msk.bf16.vlgmr.msra.gmra.mrb[64].mxu1 %vm253_vm4, %v2405_v16 }
0x1972   :  { %v2466_v24 = vpop.f32.mrb[64].mxu1 }
0x1973   :  { %v2467_v25 = vadd.f32 %v2721_v23, %v2466_v24  ;;  %v3058_v26 = vpop.f32.mrb[65].mxu1 }
0x1974   :  { %v2469_v27 = vpop.f32.mrb[66].mxu1 }
0x1975   :  { %3205 = vtanh.f32 %v2467_v25  ;;  %v3059_v28 = vpop.f32.mrb[67].mxu1 }
0x197f   :  { %v3206_v30 = vpop.eup %3205 }
0x1980   :  { %v2480_v31 = vmul.f32 %v3206_v30, %v2725_v29 }
0x1982   :  { %v2482_v57 = vsel %vm2481_vm8, %v2480_v31, 0.0 }
0x1983   :  { %2483 = vadd.xlane.f32.xlu1 %v2482_v57 }
0x1a10   :  { %v2484_v33 = vpop.xlane.xlu1 %2483 }
0x1a11   :  { %v2498_v35 = vadd.f32 %v2497_v32, %v2484_v33 }
0x1a13   :  { %v2506_v11 = vadd.f32 %v2727_v34, %v2498_v35 }
0x1a15   :  { %2508 = vst.msk [vmem:[%s2542_s21] sm:$0x3] %vm2507_vm9, %v2506_v11 }

</bundles_post_ra>
